<compile_context>
chip_gen: v5e
topology: v5e:2x2
jax: 0.10.0
libtpu: 0.0.40
codegen_flags: <defaults>
</compile_context>

<pallas_src>
import math

import jax
import jax.numpy as jnp
from jax import lax
from jax.experimental import pallas as pl
from jax.experimental.pallas import tpu as pltpu  # noqa: F401  (TPU backend assumed)

# ----- scaled-down Transformer-XL config (original: 512/512/12/512/8/2048) -----
N_TOKEN = 64      # vocab size (len(event2word) stand-in)
SEQ     = 8       # x_len
MEM     = 8       # mem_len (zero-initialized memories)
N_LAYER = 2       # n_layer
D_MODEL = 32      # d_model == d_embed
N_HEAD  = 4       # n_head
D_HEAD  = D_MODEL // N_HEAD
D_FF    = 64      # d_inner
LN_EPS  = 1e-3    # layer_norm_epsilon
BATCH   = 2
KLEN    = SEQ + MEM
SCALE   = 1.0 / math.sqrt(D_HEAD)

BQ  = BATCH * SEQ          # all query rows, batch folded into sublanes       (16)
BK  = BATCH * KLEN         # all key rows, batch folded into sublanes         (32)
BKH = N_HEAD * BK          # keys packed per head along lanes                 (128)
VOCAB_PAD = 128            # lane-dense output width
NEG_INF = -1e30            # additive mask value (f32-safe)

assert SEQ & (SEQ - 1) == 0 and KLEN & (KLEN - 1) == 0, "power-of-two sizes assumed"
assert N_TOKEN <= VOCAB_PAD
BARREL_BITS = tuple(1 << b for b in range((SEQ - 1).bit_length()))  # (1, 2, 4) for SEQ=8
NUM_BITS = len(BARREL_BITS)


# ---------------------------- fused Pallas kernel ----------------------------

def _xl_forward_kernel(onehot_ref, emb_ref, posf_ref, rwb_ref, rrb_ref,
                       qw_ref, kw_ref, vw_ref, rw_ref, ow_ref,
                       ln1g_ref, ln1b_ref, ffw1_ref, ffb1_ref, ffw2_ref, ffb2_ref,
                       ln2g_ref, ln2b_ref, linw_ref, linb_ref,
                       bias_ref, rot_ref, sel_ref, hmask_ref, out_ref):
    f32 = jnp.float32
    bf16 = jnp.bfloat16
    clast = (((1,), (1,)), ((), ()))   # A · B^T without an in-kernel transpose

    def layer_norm(x, g, b):
        mu = jnp.mean(x, axis=-1, keepdims=True)
        var = jnp.mean(jnp.square(x - mu), axis=-1, keepdims=True)
        return (x - mu) * lax.rsqrt(var + LN_EPS) * g + b

    hmask_f32 = hmask_ref[...]                 # (BKH, D) head-block mask / per-head sum matrix
    hmask_bf = hmask_f32.astype(bf16)
    att_bias = bias_ref[...]                   # (BQ, BKH) f32 additive mask (causal+cross-batch)
    rwb = rwb_ref[...]                         # (1, D) f32
    rrb = rrb_ref[...]                         # (1, D) f32
    posf = posf_ref[...]                       # (BK, D) bf16, pos tiled per batch

    # ---- token embedding: one-hot matmul on the MXU (onehot precomputed in wrapper) ----
    h = jnp.dot(onehot_ref[...], emb_ref[...],
                preferred_element_type=f32) * (D_MODEL ** 0.5)           # (BQ, D) f32

    for l in range(N_LAYER):
        # ---- rel multi-head attention (pre-lnorm). mems are zero, so LN(mem rows) == ln1_b ----
        h_ln = layer_norm(h, ln1g_ref[l], ln1b_ref[l])                   # (BQ, D) f32
        memrow = jnp.broadcast_to(ln1b_ref[l], (MEM, D_MODEL))
        cat_ln = jnp.concatenate(
            [memrow, h_ln[0 * SEQ:1 * SEQ, :],
             memrow, h_ln[1 * SEQ:2 * SEQ, :]], axis=0)                  # (BK, D) f32

        hlnb = h_ln.astype(bf16)
        catb = cat_ln.astype(bf16)

        # per-layer full-width projections, heads along lanes (head-major)
        q_all = jnp.dot(hlnb, qw_ref[l], preferred_element_type=f32)     # (BQ, D)
        k_all = jnp.dot(catb, kw_ref[l], preferred_element_type=f32)     # (BK, D)
        v_all = jnp.dot(catb, vw_ref[l], preferred_element_type=f32)     # (BK, D)
        r_all = jnp.dot(posf, rw_ref[l], preferred_element_type=f32)     # (BK, D)

        # pack heads into lanes: tile rows per head, keep only that head's model columns
        k_bf = k_all.astype(bf16)
        v_bf = v_all.astype(bf16)
        r_bf = r_all.astype(bf16)
        k_pack = jnp.concatenate([k_bf] * N_HEAD, axis=0) * hmask_bf     # (BKH, D)
        v_pack = jnp.concatenate([v_bf] * N_HEAD, axis=0) * hmask_bf     # (BKH, D)
        r_pack = jnp.concatenate([r_bf] * N_HEAD, axis=0) * hmask_bf     # (BKH, D)

        ac = lax.dot_general((q_all + rwb).astype(bf16), k_pack, clast,
                             preferred_element_type=f32)                 # (BQ, BKH)
        bd = lax.dot_general((q_all + rrb).astype(bf16), r_pack, clast,
                             preferred_element_type=f32)                 # (BQ, BKH)

        # rel_shift for all heads/batches at once: block-diagonal barrel rotation.
        # row i rotates left by (SEQ-1-i) within each 16-column block; wrapped columns are
        # exactly the ones att_bias kills, so circular rotation is exact here.
        for b in range(NUM_BITS):
            rolled = jnp.dot(bd, rot_ref[b], preferred_element_type=f32)
            bd = jnp.where(sel_ref[b] > 0.5, rolled, bd)

        score = (ac + bd) * SCALE + att_bias                             # (BQ, BKH) f32
        score = score - jnp.max(score, axis=-1, keepdims=True)           # per-head softmax is
        p = jnp.exp(score)                                               # shift-invariant
        # per-head denominators, broadcast over that head's D_HEAD output lanes
        denom = jnp.dot(p, hmask_f32, preferred_element_type=f32)        # (BQ, D)
        o_unnorm = jnp.dot(p.astype(bf16), v_pack,
                           preferred_element_type=f32)                   # (BQ, D)
        head_out = o_unnorm * pl.reciprocal(denom, approx=True)

        attn_out = jnp.dot(head_out.astype(bf16), ow_ref[l],
                           preferred_element_type=f32)                   # (BQ, D)
        h = h + attn_out                                                 # residual (pre-lnorm)

        # ---- position-wise FFN (pre-lnorm) ----
        ff_in = layer_norm(h, ln2g_ref[l], ln2b_ref[l])
        ff1 = jnp.maximum(
            jnp.dot(ff_in.astype(bf16), ffw1_ref[l],
                    preferred_element_type=f32) + ffb1_ref[l], 0.0)
        ff2 = jnp.dot(ff1.astype(bf16), ffw2_ref[l],
                      preferred_element_type=f32) + ffb2_ref[l]
        h = h + ff2

    # last_hidden_state -> dropout (identity, inference) -> vocab linear (lane-dense padded)
    out_ref[...] = jnp.dot(h.astype(bf16), linw_ref[...],
                           preferred_element_type=f32) + linb_ref[...]


# ---------------------------- wrapper / params ----------------------------

def init_params(key):
    std = 0.02
    ks = jax.random.split(key, 9)
    nrm = lambda k, s: jax.random.normal(k, s, jnp.float32) * std
    return {
        "emb":      nrm(ks[0], (N_TOKEN, D_MODEL)),
        "r_w_bias": nrm(ks[1], (N_HEAD, D_HEAD)),
        "r_r_bias": nrm(ks[2], (N_HEAD, D_HEAD)),
        "lin_w":    nrm(ks[3], (D_MODEL, N_TOKEN)),
        "lin_b":    jnp.zeros((N_TOKEN,), jnp.float32),
        "qkv_w":    nrm(ks[4], (N_LAYER, D_MODEL, 3 * D_MODEL)),
        "r_w":      nrm(ks[5], (N_LAYER, D_MODEL, D_MODEL)),
        "o_w":      nrm(ks[6], (N_LAYER, D_MODEL, D_MODEL)),
        "ln1_g":    jnp.ones((N_LAYER, 1, D_MODEL), jnp.float32),
        "ln1_b":    jnp.zeros((N_LAYER, 1, D_MODEL), jnp.float32),
        "ff_w1":    nrm(ks[7], (N_LAYER, D_MODEL, D_FF)),
        "ff_b1":    jnp.zeros((N_LAYER, 1, D_FF), jnp.float32),
        "ff_w2":    nrm(ks[8], (N_LAYER, D_FF, D_MODEL)),
        "ff_b2":    jnp.zeros((N_LAYER, 1, D_MODEL), jnp.float32),
        "ln2_g":    jnp.ones((N_LAYER, 1, D_MODEL), jnp.float32),
        "ln2_b":    jnp.zeros((N_LAYER, 1, D_MODEL), jnp.float32),
    }


def model_forward(params, ids):
    """ids: (BATCH, SEQ) int32 token ids -> logits (BATCH, SEQ, N_TOKEN)."""
    B, Q = ids.shape
    L, H, D, Dh = N_LAYER, N_HEAD, D_MODEL, D_HEAD
    bf16 = jnp.bfloat16

    # relative sinusoidal positional embedding for positions klen-1 .. 0, tiled per batch
    pos_seq = jnp.arange(KLEN - 1, -1, -1, dtype=jnp.float32)
    inv_freq = 1.0 / (10000.0 ** (jnp.arange(0, D, 2, dtype=jnp.float32) / D))
    sinusoid = pos_seq[:, None] * inv_freq[None, :]
    pos_emb = jnp.concatenate([jnp.sin(sinusoid), jnp.cos(sinusoid)], axis=-1)  # (KLEN, D)
    pos_full = jnp.tile(pos_emb, (BATCH, 1)).astype(bf16)                       # (BK, D)

    # per-layer full-width projection weights (output lanes head-major) in bf16
    qkv = params["qkv_w"].reshape(L, D, 3, D)
    qw = qkv[:, :, 0, :].astype(bf16)
    kw = qkv[:, :, 1, :].astype(bf16)
    vw = qkv[:, :, 2, :].astype(bf16)
    rw = params["r_w"].astype(bf16)
    ow = params["o_w"].astype(bf16)

    # one-hot token ids (batch folded into rows, b-major)
    ids_flat = ids.reshape(BQ, 1).astype(jnp.int32)
    one_hot = (ids_flat == jnp.arange(N_TOKEN, dtype=jnp.int32)[None, :]).astype(bf16)

    # -------- data-independent constants (constant-folded by XLA outside the kernel) --------
    rows = jnp.arange(BQ, dtype=jnp.int32)
    i_q = rows % SEQ
    b_q = rows // SEQ
    cols = jnp.arange(BKH, dtype=jnp.int32)
    rem = cols % BK
    b_k = rem // KLEN
    j_k = rem % KLEN

    # additive attention bias: causal (j > i + MEM) + cross-batch keys, same per head block
    valid = (b_q[:, None] == b_k[None, :]) & (j_k[None, :] <= i_q[:, None] + MEM)
    att_bias = jnp.where(valid, 0.0, NEG_INF).astype(jnp.float32)               # (BQ, BKH)

    # block-diagonal barrel-rotation permutation matrices (left rotation by `amt` per 16-block)
    blk = cols // KLEN
    pos_c = cols % KLEN
    rot_mats = jnp.stack([
        ((blk[:, None] == blk[None, :]) &
         (pos_c[:, None] == ((pos_c[None, :] + amt) % KLEN))).astype(jnp.float32)
        for amt in BARREL_BITS])                                                # (NB, BKH, BKH)

    # per-row "apply this rotation step" select masks
    shift_amt = (SEQ - 1) - i_q
    sel = jnp.stack([
        jnp.broadcast_to(((shift_amt & bit) != 0).astype(jnp.float32)[:, None], (BQ, BKH))
        for bit in BARREL_BITS])                                                # (NB, BQ, BKH)

    # head-block mask: row h*BK+j keeps only head h's D_HEAD model columns.
    # Doubles as the per-head softmax-denominator reduction matrix.
    hmask = ((cols[:, None] // BK) ==
             (jnp.arange(D, dtype=jnp.int32)[None, :] // Dh)).astype(jnp.float32)  # (BKH, D)

    # lane-dense (padded to 128) vocab projection
    lin_w = jnp.zeros((D, VOCAB_PAD), jnp.float32).at[:, :N_TOKEN].set(
        params["lin_w"]).astype(bf16)
    lin_b = jnp.zeros((1, VOCAB_PAD), jnp.float32).at[:, :N_TOKEN].set(
        params["lin_b"][None, :])

    logits_pad = pl.pallas_call(
        _xl_forward_kernel,
        out_shape=jax.ShapeDtypeStruct((BQ, VOCAB_PAD), jnp.float32),
    )(
        one_hot, params["emb"].astype(bf16), pos_full,
        params["r_w_bias"].reshape(1, D),
        params["r_r_bias"].reshape(1, D),
        qw, kw, vw, rw, ow,
        params["ln1_g"], params["ln1_b"],
        params["ff_w1"].astype(bf16), params["ff_b1"],
        params["ff_w2"].astype(bf16), params["ff_b2"],
        params["ln2_g"], params["ln2_b"],
        lin_w, lin_b,
        att_bias, rot_mats, sel, hmask,
    )
    return logits_pad[:, :N_TOKEN].reshape(B, Q, N_TOKEN)


if __name__ == "__main__":
    key = jax.random.PRNGKey(0)
    pkey, xkey = jax.random.split(key)
    params = init_params(pkey)
    x = jax.random.randint(xkey, (BATCH, SEQ), 0, N_TOKEN, dtype=jnp.int32)

    logits = jax.jit(model_forward)(params, x)
    jax.block_until_ready(logits)
    assert logits.shape == (BATCH, SEQ, N_TOKEN)
    assert bool(jnp.all(jnp.isfinite(logits)))
    print("KERNEL_OK")
</pallas_src>

<mosaic_0001>
module attributes {stable_mosaic.version = 11 : i64} {
  func.func @_xl_forward_kernel(%arg0: memref<16x64xbf16, #tpu.memory_space<vmem>>, %arg1: memref<64x32xbf16, #tpu.memory_space<vmem>>, %arg2: memref<32x32xbf16, #tpu.memory_space<vmem>>, %arg3: memref<1x32xf32, #tpu.memory_space<vmem>>, %arg4: memref<1x32xf32, #tpu.memory_space<vmem>>, %arg5: memref<2x32x32xbf16, #tpu.memory_space<vmem>>, %arg6: memref<2x32x32xbf16, #tpu.memory_space<vmem>>, %arg7: memref<2x32x32xbf16, #tpu.memory_space<vmem>>, %arg8: memref<2x32x32xbf16, #tpu.memory_space<vmem>>, %arg9: memref<2x32x32xbf16, #tpu.memory_space<vmem>>, %arg10: memref<2x1x32xf32, #tpu.memory_space<vmem>>, %arg11: memref<2x1x32xf32, #tpu.memory_space<vmem>>, %arg12: memref<2x32x64xbf16, #tpu.memory_space<vmem>>, %arg13: memref<2x1x64xf32, #tpu.memory_space<vmem>>, %arg14: memref<2x64x32xbf16, #tpu.memory_space<vmem>>, %arg15: memref<2x1x32xf32, #tpu.memory_space<vmem>>, %arg16: memref<2x1x32xf32, #tpu.memory_space<vmem>>, %arg17: memref<2x1x32xf32, #tpu.memory_space<vmem>>, %arg18: memref<32x128xbf16, #tpu.memory_space<vmem>>, %arg19: memref<1x128xf32, #tpu.memory_space<vmem>>, %arg20: memref<16x128xf32, #tpu.memory_space<vmem>>, %arg21: memref<3x128x128xf32, #tpu.memory_space<vmem>>, %arg22: memref<3x16x128xf32, #tpu.memory_space<vmem>>, %arg23: memref<128x32xf32, #tpu.memory_space<vmem>>, %arg24: memref<16x128xf32, #tpu.memory_space<vmem>>) attributes {dimension_semantics = [], scalar_prefetch = 0 : i64, scratch_operands = 0 : i64, tpu.core_type = #tpu.core_type<tc>} {
    %c0 = arith.constant 0 : index
    %c0_0 = arith.constant 0 : index
    %0 = vector.load %arg23[%c0, %c0_0] : memref<128x32xf32, #tpu.memory_space<vmem>>, vector<128x32xf32>
    %1 = arith.truncf %0 : vector<128x32xf32> to vector<128x32xbf16>
    %c0_1 = arith.constant 0 : index
    %c0_2 = arith.constant 0 : index
    %2 = vector.load %arg20[%c0_1, %c0_2] : memref<16x128xf32, #tpu.memory_space<vmem>>, vector<16x128xf32>
    %c0_3 = arith.constant 0 : index
    %c0_4 = arith.constant 0 : index
    %3 = vector.load %arg3[%c0_3, %c0_4] : memref<1x32xf32, #tpu.memory_space<vmem>>, vector<1x32xf32>
    %c0_5 = arith.constant 0 : index
    %c0_6 = arith.constant 0 : index
    %4 = vector.load %arg4[%c0_5, %c0_6] : memref<1x32xf32, #tpu.memory_space<vmem>>, vector<1x32xf32>
    %c0_7 = arith.constant 0 : index
    %c0_8 = arith.constant 0 : index
    %5 = vector.load %arg2[%c0_7, %c0_8] : memref<32x32xbf16, #tpu.memory_space<vmem>>, vector<32x32xbf16>
    %c0_9 = arith.constant 0 : index
    %c0_10 = arith.constant 0 : index
    %6 = vector.load %arg0[%c0_9, %c0_10] : memref<16x64xbf16, #tpu.memory_space<vmem>>, vector<16x64xbf16>
    %c0_11 = arith.constant 0 : index
    %c0_12 = arith.constant 0 : index
    %7 = vector.load %arg1[%c0_11, %c0_12] : memref<64x32xbf16, #tpu.memory_space<vmem>>, vector<64x32xbf16>
    %cst = arith.constant dense<0.000000e+00> : vector<16x32xf32>
    %8 = tpu.matmul %6, %7, %cst {dimension_numbers = #tpu.dot_dimension_numbers<[1], [0], [0], [1], [0, 0, 1, 1], [], []>} : vector<16x64xbf16>, vector<64x32xbf16>, vector<16x32xf32> -> vector<16x32xf32>
    %cst_13 = arith.constant 5.65685415 : f32
    %9 = vector.broadcast %cst_13 : f32 to vector<16x32xf32>
    %10 = arith.mulf %8, %9 : vector<16x32xf32>
    %c0_14 = arith.constant 0 : index
    %c0_15 = arith.constant 0 : index
    %c0_16 = arith.constant 0 : index
    %11 = vector.load %arg10[%c0_14, %c0_15, %c0_16] : memref<2x1x32xf32, #tpu.memory_space<vmem>>, vector<1x1x32xf32>
    %12 = vector.shape_cast %11 : vector<1x1x32xf32> to vector<1x32xf32>
    %c0_17 = arith.constant 0 : index
    %c0_18 = arith.constant 0 : index
    %c0_19 = arith.constant 0 : index
    %13 = vector.load %arg11[%c0_17, %c0_18, %c0_19] : memref<2x1x32xf32, #tpu.memory_space<vmem>>, vector<1x1x32xf32>
    %14 = vector.shape_cast %13 : vector<1x1x32xf32> to vector<1x32xf32>
    %cst_20 = arith.constant dense<0.000000e+00> : vector<16xf32>
    %15 = vector.multi_reduction <add>, %10, %cst_20 [1] : vector<16x32xf32> to vector<16xf32>
    %16 = vector.shape_cast %15 : vector<16xf32> to vector<16x1xf32>
    %cst_21 = arith.constant 3.200000e+01 : f32
    %17 = vector.broadcast %cst_21 : f32 to vector<16x1xf32>
    %18 = arith.divf %16, %17 : vector<16x1xf32>
    %19 = vector.broadcast %18 : vector<16x1xf32> to vector<16x32xf32>
    %20 = arith.subf %10, %19 : vector<16x32xf32>
    %21 = arith.mulf %20, %20 : vector<16x32xf32>
    %cst_22 = arith.constant dense<0.000000e+00> : vector<16xf32>
    %22 = vector.multi_reduction <add>, %21, %cst_22 [1] : vector<16x32xf32> to vector<16xf32>
    %23 = vector.shape_cast %22 : vector<16xf32> to vector<16x1xf32>
    %cst_23 = arith.constant 3.200000e+01 : f32
    %24 = vector.broadcast %cst_23 : f32 to vector<16x1xf32>
    %25 = arith.divf %23, %24 : vector<16x1xf32>
    %26 = vector.broadcast %18 : vector<16x1xf32> to vector<16x32xf32>
    %27 = arith.subf %10, %26 : vector<16x32xf32>
    %cst_24 = arith.constant 1.000000e-03 : f32
    %28 = vector.broadcast %cst_24 : f32 to vector<16x1xf32>
    %29 = arith.addf %25, %28 : vector<16x1xf32>
    %30 = math.rsqrt %29 : vector<16x1xf32>
    %31 = vector.broadcast %30 : vector<16x1xf32> to vector<16x32xf32>
    %32 = arith.mulf %27, %31 : vector<16x32xf32>
    %33 = vector.broadcast %12 : vector<1x32xf32> to vector<16x32xf32>
    %34 = arith.mulf %32, %33 : vector<16x32xf32>
    %35 = vector.broadcast %14 : vector<1x32xf32> to vector<16x32xf32>
    %36 = arith.addf %34, %35 : vector<16x32xf32>
    %c0_25 = arith.constant 0 : index
    %c0_26 = arith.constant 0 : index
    %c0_27 = arith.constant 0 : index
    %37 = vector.load %arg11[%c0_25, %c0_26, %c0_27] : memref<2x1x32xf32, #tpu.memory_space<vmem>>, vector<1x1x32xf32>
    %38 = vector.shape_cast %37 : vector<1x1x32xf32> to vector<1x32xf32>
    %39 = vector.shape_cast %38 : vector<1x32xf32> to vector<1x32xf32>
    %40 = vector.broadcast %39 : vector<1x32xf32> to vector<8x32xf32>
    %41 = vector.extract_strided_slice %36 {offsets = [0, 0], sizes = [8, 32], strides = [1, 1]} : vector<16x32xf32> to vector<8x32xf32>
    %42 = vector.extract_strided_slice %36 {offsets = [8, 0], sizes = [8, 32], strides = [1, 1]} : vector<16x32xf32> to vector<8x32xf32>
    %43 = tpu.concatenate %40, %41, %40, %42 in 0 : vector<8x32xf32>, vector<8x32xf32>, vector<8x32xf32>, vector<8x32xf32> -> vector<32x32xf32>
    %44 = arith.truncf %36 : vector<16x32xf32> to vector<16x32xbf16>
    %45 = arith.truncf %43 : vector<32x32xf32> to vector<32x32xbf16>
    %c0_28 = arith.constant 0 : index
    %c0_29 = arith.constant 0 : index
    %c0_30 = arith.constant 0 : index
    %46 = vector.load %arg5[%c0_28, %c0_29, %c0_30] : memref<2x32x32xbf16, #tpu.memory_space<vmem>>, vector<1x32x32xbf16>
    %47 = vector.shape_cast %46 : vector<1x32x32xbf16> to vector<32x32xbf16>
    %cst_31 = arith.constant dense<0.000000e+00> : vector<16x32xf32>
    %48 = tpu.matmul %44, %47, %cst_31 {dimension_numbers = #tpu.dot_dimension_numbers<[1], [0], [0], [1], [0, 0, 1, 1], [], []>} : vector<16x32xbf16>, vector<32x32xbf16>, vector<16x32xf32> -> vector<16x32xf32>
    %c0_32 = arith.constant 0 : index
    %c0_33 = arith.constant 0 : index
    %c0_34 = arith.constant 0 : index
    %49 = vector.load %arg6[%c0_32, %c0_33, %c0_34] : memref<2x32x32xbf16, #tpu.memory_space<vmem>>, vector<1x32x32xbf16>
    %50 = vector.shape_cast %49 : vector<1x32x32xbf16> to vector<32x32xbf16>
    %cst_35 = arith.constant dense<0.000000e+00> : vector<32x32xf32>
    %51 = tpu.matmul %45, %50, %cst_35 {dimension_numbers = #tpu.dot_dimension_numbers<[1], [0], [0], [1], [0, 0, 1, 1], [], []>} : vector<32x32xbf16>, vector<32x32xbf16>, vector<32x32xf32> -> vector<32x32xf32>
    %c0_36 = arith.constant 0 : index
    %c0_37 = arith.constant 0 : index
    %c0_38 = arith.constant 0 : index
    %52 = vector.load %arg7[%c0_36, %c0_37, %c0_38] : memref<2x32x32xbf16, #tpu.memory_space<vmem>>, vector<1x32x32xbf16>
    %53 = vector.shape_cast %52 : vector<1x32x32xbf16> to vector<32x32xbf16>
    %cst_39 = arith.constant dense<0.000000e+00> : vector<32x32xf32>
    %54 = tpu.matmul %45, %53, %cst_39 {dimension_numbers = #tpu.dot_dimension_numbers<[1], [0], [0], [1], [0, 0, 1, 1], [], []>} : vector<32x32xbf16>, vector<32x32xbf16>, vector<32x32xf32> -> vector<32x32xf32>
    %c0_40 = arith.constant 0 : index
    %c0_41 = arith.constant 0 : index
    %c0_42 = arith.constant 0 : index
    %55 = vector.load %arg8[%c0_40, %c0_41, %c0_42] : memref<2x32x32xbf16, #tpu.memory_space<vmem>>, vector<1x32x32xbf16>
    %56 = vector.shape_cast %55 : vector<1x32x32xbf16> to vector<32x32xbf16>
    %cst_43 = arith.constant dense<0.000000e+00> : vector<32x32xf32>
    %57 = tpu.matmul %5, %56, %cst_43 {dimension_numbers = #tpu.dot_dimension_numbers<[1], [0], [0], [1], [0, 0, 1, 1], [], []>} : vector<32x32xbf16>, vector<32x32xbf16>, vector<32x32xf32> -> vector<32x32xf32>
    %58 = arith.truncf %51 : vector<32x32xf32> to vector<32x32xbf16>
    %59 = arith.truncf %54 : vector<32x32xf32> to vector<32x32xbf16>
    %60 = arith.truncf %57 : vector<32x32xf32> to vector<32x32xbf16>
    %61 = tpu.concatenate %58, %58, %58, %58 in 0 : vector<32x32xbf16>, vector<32x32xbf16>, vector<32x32xbf16>, vector<32x32xbf16> -> vector<128x32xbf16>
    %62 = arith.mulf %61, %1 : vector<128x32xbf16>
    %63 = tpu.concatenate %59, %59, %59, %59 in 0 : vector<32x32xbf16>, vector<32x32xbf16>, vector<32x32xbf16>, vector<32x32xbf16> -> vector<128x32xbf16>
    %64 = arith.mulf %63, %1 : vector<128x32xbf16>
    %65 = tpu.concatenate %60, %60, %60, %60 in 0 : vector<32x32xbf16>, vector<32x32xbf16>, vector<32x32xbf16>, vector<32x32xbf16> -> vector<128x32xbf16>
    %66 = arith.mulf %65, %1 : vector<128x32xbf16>
    %67 = vector.broadcast %3 : vector<1x32xf32> to vector<16x32xf32>
    %68 = arith.addf %48, %67 : vector<16x32xf32>
    %69 = arith.truncf %68 : vector<16x32xf32> to vector<16x32xbf16>
    %cst_44 = arith.constant dense<0.000000e+00> : vector<16x128xf32>
    %70 = tpu.matmul %69, %62, %cst_44 {dimension_numbers = #tpu.dot_dimension_numbers<[1], [1], [0], [0], [0, 0, 1, 0], [], []>} : vector<16x32xbf16>, vector<128x32xbf16>, vector<16x128xf32> -> vector<16x128xf32>
    %71 = vector.broadcast %4 : vector<1x32xf32> to vector<16x32xf32>
    %72 = arith.addf %48, %71 : vector<16x32xf32>
    %73 = arith.truncf %72 : vector<16x32xf32> to vector<16x32xbf16>
    %cst_45 = arith.constant dense<0.000000e+00> : vector<16x128xf32>
    %74 = tpu.matmul %73, %66, %cst_45 {dimension_numbers = #tpu.dot_dimension_numbers<[1], [1], [0], [0], [0, 0, 1, 0], [], []>} : vector<16x32xbf16>, vector<128x32xbf16>, vector<16x128xf32> -> vector<16x128xf32>
    %c0_46 = arith.constant 0 : index
    %c0_47 = arith.constant 0 : index
    %c0_48 = arith.constant 0 : index
    %75 = vector.load %arg21[%c0_46, %c0_47, %c0_48] : memref<3x128x128xf32, #tpu.memory_space<vmem>>, vector<1x128x128xf32>
    %76 = vector.shape_cast %75 : vector<1x128x128xf32> to vector<128x128xf32>
    %cst_49 = arith.constant dense<0.000000e+00> : vector<16x128xf32>
    %77 = tpu.matmul %74, %76, %cst_49 {dimension_numbers = #tpu.dot_dimension_numbers<[1], [0], [0], [1], [0, 0, 1, 1], [], []>} : vector<16x128xf32>, vector<128x128xf32>, vector<16x128xf32> -> vector<16x128xf32>
    %c0_50 = arith.constant 0 : index
    %c0_51 = arith.constant 0 : index
    %c0_52 = arith.constant 0 : index
    %78 = vector.load %arg22[%c0_50, %c0_51, %c0_52] : memref<3x16x128xf32, #tpu.memory_space<vmem>>, vector<1x16x128xf32>
    %79 = vector.shape_cast %78 : vector<1x16x128xf32> to vector<16x128xf32>
    %cst_53 = arith.constant 5.000000e-01 : f32
    %80 = vector.broadcast %cst_53 : f32 to vector<16x128xf32>
    %81 = arith.cmpf ogt, %79, %80 : vector<16x128xf32>
    %82 = arith.select %81, %77, %74 : vector<16x128xi1>, vector<16x128xf32>
    %c1 = arith.constant 1 : index
    %c0_54 = arith.constant 0 : index
    %c0_55 = arith.constant 0 : index
    %83 = vector.load %arg21[%c1, %c0_54, %c0_55] : memref<3x128x128xf32, #tpu.memory_space<vmem>>, vector<1x128x128xf32>
    %84 = vector.shape_cast %83 : vector<1x128x128xf32> to vector<128x128xf32>
    %cst_56 = arith.constant dense<0.000000e+00> : vector<16x128xf32>
    %85 = tpu.matmul %82, %84, %cst_56 {dimension_numbers = #tpu.dot_dimension_numbers<[1], [0], [0], [1], [0, 0, 1, 1], [], []>} : vector<16x128xf32>, vector<128x128xf32>, vector<16x128xf32> -> vector<16x128xf32>
    %c1_57 = arith.constant 1 : index
    %c0_58 = arith.constant 0 : index
    %c0_59 = arith.constant 0 : index
    %86 = vector.load %arg22[%c1_57, %c0_58, %c0_59] : memref<3x16x128xf32, #tpu.memory_space<vmem>>, vector<1x16x128xf32>
    %87 = vector.shape_cast %86 : vector<1x16x128xf32> to vector<16x128xf32>
    %cst_60 = arith.constant 5.000000e-01 : f32
    %88 = vector.broadcast %cst_60 : f32 to vector<16x128xf32>
    %89 = arith.cmpf ogt, %87, %88 : vector<16x128xf32>
    %90 = arith.select %89, %85, %82 : vector<16x128xi1>, vector<16x128xf32>
    %c2 = arith.constant 2 : index
    %c0_61 = arith.constant 0 : index
    %c0_62 = arith.constant 0 : index
    %91 = vector.load %arg21[%c2, %c0_61, %c0_62] : memref<3x128x128xf32, #tpu.memory_space<vmem>>, vector<1x128x128xf32>
    %92 = vector.shape_cast %91 : vector<1x128x128xf32> to vector<128x128xf32>
    %cst_63 = arith.constant dense<0.000000e+00> : vector<16x128xf32>
    %93 = tpu.matmul %90, %92, %cst_63 {dimension_numbers = #tpu.dot_dimension_numbers<[1], [0], [0], [1], [0, 0, 1, 1], [], []>} : vector<16x128xf32>, vector<128x128xf32>, vector<16x128xf32> -> vector<16x128xf32>
    %c2_64 = arith.constant 2 : index
    %c0_65 = arith.constant 0 : index
    %c0_66 = arith.constant 0 : index
    %94 = vector.load %arg22[%c2_64, %c0_65, %c0_66] : memref<3x16x128xf32, #tpu.memory_space<vmem>>, vector<1x16x128xf32>
    %95 = vector.shape_cast %94 : vector<1x16x128xf32> to vector<16x128xf32>
    %cst_67 = arith.constant 5.000000e-01 : f32
    %96 = vector.broadcast %cst_67 : f32 to vector<16x128xf32>
    %97 = arith.cmpf ogt, %95, %96 : vector<16x128xf32>
    %98 = arith.select %97, %93, %90 : vector<16x128xi1>, vector<16x128xf32>
    %99 = arith.addf %70, %98 : vector<16x128xf32>
    %cst_68 = arith.constant 0.353553385 : f32
    %100 = vector.broadcast %cst_68 : f32 to vector<16x128xf32>
    %101 = arith.mulf %99, %100 : vector<16x128xf32>
    %102 = arith.addf %101, %2 : vector<16x128xf32>
    %cst_69 = arith.constant dense<0xFF800000> : vector<16xf32>
    %103 = vector.multi_reduction <maximumf>, %102, %cst_69 [1] : vector<16x128xf32> to vector<16xf32>
    %104 = vector.shape_cast %103 : vector<16xf32> to vector<16x1xf32>
    %105 = vector.broadcast %104 : vector<16x1xf32> to vector<16x128xf32>
    %106 = arith.subf %102, %105 : vector<16x128xf32>
    %107 = math.exp %106 : vector<16x128xf32>
    %cst_70 = arith.constant dense<0.000000e+00> : vector<16x32xf32>
    %108 = tpu.matmul %107, %0, %cst_70 {dimension_numbers = #tpu.dot_dimension_numbers<[1], [0], [0], [1], [0, 0, 1, 1], [], []>} : vector<16x128xf32>, vector<128x32xf32>, vector<16x32xf32> -> vector<16x32xf32>
    %109 = arith.truncf %107 : vector<16x128xf32> to vector<16x128xbf16>
    %cst_71 = arith.constant dense<0.000000e+00> : vector<16x32xf32>
    %110 = tpu.matmul %109, %64, %cst_71 {dimension_numbers = #tpu.dot_dimension_numbers<[1], [0], [0], [1], [0, 0, 1, 1], [], []>} : vector<16x128xbf16>, vector<128x32xbf16>, vector<16x32xf32> -> vector<16x32xf32>
    %111 = tpu.reciprocal %108 {approx = true} : vector<16x32xf32> -> vector<16x32xf32>
    %112 = arith.mulf %110, %111 : vector<16x32xf32>
    %113 = arith.truncf %112 : vector<16x32xf32> to vector<16x32xbf16>
    %c0_72 = arith.constant 0 : index
    %c0_73 = arith.constant 0 : index
    %c0_74 = arith.constant 0 : index
    %114 = vector.load %arg9[%c0_72, %c0_73, %c0_74] : memref<2x32x32xbf16, #tpu.memory_space<vmem>>, vector<1x32x32xbf16>
    %115 = vector.shape_cast %114 : vector<1x32x32xbf16> to vector<32x32xbf16>
    %cst_75 = arith.constant dense<0.000000e+00> : vector<16x32xf32>
    %116 = tpu.matmul %113, %115, %cst_75 {dimension_numbers = #tpu.dot_dimension_numbers<[1], [0], [0], [1], [0, 0, 1, 1], [], []>} : vector<16x32xbf16>, vector<32x32xbf16>, vector<16x32xf32> -> vector<16x32xf32>
    %117 = arith.addf %10, %116 : vector<16x32xf32>
    %c0_76 = arith.constant 0 : index
    %c0_77 = arith.constant 0 : index
    %c0_78 = arith.constant 0 : index
    %118 = vector.load %arg16[%c0_76, %c0_77, %c0_78] : memref<2x1x32xf32, #tpu.memory_space<vmem>>, vector<1x1x32xf32>
    %119 = vector.shape_cast %118 : vector<1x1x32xf32> to vector<1x32xf32>
    %c0_79 = arith.constant 0 : index
    %c0_80 = arith.constant 0 : index
    %c0_81 = arith.constant 0 : index
    %120 = vector.load %arg17[%c0_79, %c0_80, %c0_81] : memref<2x1x32xf32, #tpu.memory_space<vmem>>, vector<1x1x32xf32>
    %121 = vector.shape_cast %120 : vector<1x1x32xf32> to vector<1x32xf32>
    %cst_82 = arith.constant dense<0.000000e+00> : vector<16xf32>
    %122 = vector.multi_reduction <add>, %117, %cst_82 [1] : vector<16x32xf32> to vector<16xf32>
    %123 = vector.shape_cast %122 : vector<16xf32> to vector<16x1xf32>
    %cst_83 = arith.constant 3.200000e+01 : f32
    %124 = vector.broadcast %cst_83 : f32 to vector<16x1xf32>
    %125 = arith.divf %123, %124 : vector<16x1xf32>
    %126 = vector.broadcast %125 : vector<16x1xf32> to vector<16x32xf32>
    %127 = arith.subf %117, %126 : vector<16x32xf32>
    %128 = arith.mulf %127, %127 : vector<16x32xf32>
    %cst_84 = arith.constant dense<0.000000e+00> : vector<16xf32>
    %129 = vector.multi_reduction <add>, %128, %cst_84 [1] : vector<16x32xf32> to vector<16xf32>
    %130 = vector.shape_cast %129 : vector<16xf32> to vector<16x1xf32>
    %cst_85 = arith.constant 3.200000e+01 : f32
    %131 = vector.broadcast %cst_85 : f32 to vector<16x1xf32>
    %132 = arith.divf %130, %131 : vector<16x1xf32>
    %133 = vector.broadcast %125 : vector<16x1xf32> to vector<16x32xf32>
    %134 = arith.subf %117, %133 : vector<16x32xf32>
    %cst_86 = arith.constant 1.000000e-03 : f32
    %135 = vector.broadcast %cst_86 : f32 to vector<16x1xf32>
    %136 = arith.addf %132, %135 : vector<16x1xf32>
    %137 = math.rsqrt %136 : vector<16x1xf32>
    %138 = vector.broadcast %137 : vector<16x1xf32> to vector<16x32xf32>
    %139 = arith.mulf %134, %138 : vector<16x32xf32>
    %140 = vector.broadcast %119 : vector<1x32xf32> to vector<16x32xf32>
    %141 = arith.mulf %139, %140 : vector<16x32xf32>
    %142 = vector.broadcast %121 : vector<1x32xf32> to vector<16x32xf32>
    %143 = arith.addf %141, %142 : vector<16x32xf32>
    %144 = arith.truncf %143 : vector<16x32xf32> to vector<16x32xbf16>
    %c0_87 = arith.constant 0 : index
    %c0_88 = arith.constant 0 : index
    %c0_89 = arith.constant 0 : index
    %145 = vector.load %arg12[%c0_87, %c0_88, %c0_89] : memref<2x32x64xbf16, #tpu.memory_space<vmem>>, vector<1x32x64xbf16>
    %146 = vector.shape_cast %145 : vector<1x32x64xbf16> to vector<32x64xbf16>
    %cst_90 = arith.constant dense<0.000000e+00> : vector<16x64xf32>
    %147 = tpu.matmul %144, %146, %cst_90 {dimension_numbers = #tpu.dot_dimension_numbers<[1], [0], [0], [1], [0, 0, 1, 1], [], []>} : vector<16x32xbf16>, vector<32x64xbf16>, vector<16x64xf32> -> vector<16x64xf32>
    %c0_91 = arith.constant 0 : index
    %c0_92 = arith.constant 0 : index
    %c0_93 = arith.constant 0 : index
    %148 = vector.load %arg13[%c0_91, %c0_92, %c0_93] : memref<2x1x64xf32, #tpu.memory_space<vmem>>, vector<1x1x64xf32>
    %149 = vector.shape_cast %148 : vector<1x1x64xf32> to vector<1x64xf32>
    %150 = vector.broadcast %149 : vector<1x64xf32> to vector<16x64xf32>
    %151 = arith.addf %147, %150 : vector<16x64xf32>
    %cst_94 = arith.constant 0.000000e+00 : f32
    %152 = vector.broadcast %cst_94 : f32 to vector<16x64xf32>
    %153 = arith.maximumf %151, %152 : vector<16x64xf32>
    %154 = arith.truncf %153 : vector<16x64xf32> to vector<16x64xbf16>
    %c0_95 = arith.constant 0 : index
    %c0_96 = arith.constant 0 : index
    %c0_97 = arith.constant 0 : index
    %155 = vector.load %arg14[%c0_95, %c0_96, %c0_97] : memref<2x64x32xbf16, #tpu.memory_space<vmem>>, vector<1x64x32xbf16>
    %156 = vector.shape_cast %155 : vector<1x64x32xbf16> to vector<64x32xbf16>
    %cst_98 = arith.constant dense<0.000000e+00> : vector<16x32xf32>
    %157 = tpu.matmul %154, %156, %cst_98 {dimension_numbers = #tpu.dot_dimension_numbers<[1], [0], [0], [1], [0, 0, 1, 1], [], []>} : vector<16x64xbf16>, vector<64x32xbf16>, vector<16x32xf32> -> vector<16x32xf32>
    %c0_99 = arith.constant 0 : index
    %c0_100 = arith.constant 0 : index
    %c0_101 = arith.constant 0 : index
    %158 = vector.load %arg15[%c0_99, %c0_100, %c0_101] : memref<2x1x32xf32, #tpu.memory_space<vmem>>, vector<1x1x32xf32>
    %159 = vector.shape_cast %158 : vector<1x1x32xf32> to vector<1x32xf32>
    %160 = vector.broadcast %159 : vector<1x32xf32> to vector<16x32xf32>
    %161 = arith.addf %157, %160 : vector<16x32xf32>
    %162 = arith.addf %117, %161 : vector<16x32xf32>
    %c1_102 = arith.constant 1 : index
    %c0_103 = arith.constant 0 : index
    %c0_104 = arith.constant 0 : index
    %163 = vector.load %arg10[%c1_102, %c0_103, %c0_104] : memref<2x1x32xf32, #tpu.memory_space<vmem>>, vector<1x1x32xf32>
    %164 = vector.shape_cast %163 : vector<1x1x32xf32> to vector<1x32xf32>
    %c1_105 = arith.constant 1 : index
    %c0_106 = arith.constant 0 : index
    %c0_107 = arith.constant 0 : index
    %165 = vector.load %arg11[%c1_105, %c0_106, %c0_107] : memref<2x1x32xf32, #tpu.memory_space<vmem>>, vector<1x1x32xf32>
    %166 = vector.shape_cast %165 : vector<1x1x32xf32> to vector<1x32xf32>
    %cst_108 = arith.constant dense<0.000000e+00> : vector<16xf32>
    %167 = vector.multi_reduction <add>, %162, %cst_108 [1] : vector<16x32xf32> to vector<16xf32>
    %168 = vector.shape_cast %167 : vector<16xf32> to vector<16x1xf32>
    %cst_109 = arith.constant 3.200000e+01 : f32
    %169 = vector.broadcast %cst_109 : f32 to vector<16x1xf32>
    %170 = arith.divf %168, %169 : vector<16x1xf32>
    %171 = vector.broadcast %170 : vector<16x1xf32> to vector<16x32xf32>
    %172 = arith.subf %162, %171 : vector<16x32xf32>
    %173 = arith.mulf %172, %172 : vector<16x32xf32>
    %cst_110 = arith.constant dense<0.000000e+00> : vector<16xf32>
    %174 = vector.multi_reduction <add>, %173, %cst_110 [1] : vector<16x32xf32> to vector<16xf32>
    %175 = vector.shape_cast %174 : vector<16xf32> to vector<16x1xf32>
    %cst_111 = arith.constant 3.200000e+01 : f32
    %176 = vector.broadcast %cst_111 : f32 to vector<16x1xf32>
    %177 = arith.divf %175, %176 : vector<16x1xf32>
    %178 = vector.broadcast %170 : vector<16x1xf32> to vector<16x32xf32>
    %179 = arith.subf %162, %178 : vector<16x32xf32>
    %cst_112 = arith.constant 1.000000e-03 : f32
    %180 = vector.broadcast %cst_112 : f32 to vector<16x1xf32>
    %181 = arith.addf %177, %180 : vector<16x1xf32>
    %182 = math.rsqrt %181 : vector<16x1xf32>
    %183 = vector.broadcast %182 : vector<16x1xf32> to vector<16x32xf32>
    %184 = arith.mulf %179, %183 : vector<16x32xf32>
    %185 = vector.broadcast %164 : vector<1x32xf32> to vector<16x32xf32>
    %186 = arith.mulf %184, %185 : vector<16x32xf32>
    %187 = vector.broadcast %166 : vector<1x32xf32> to vector<16x32xf32>
    %188 = arith.addf %186, %187 : vector<16x32xf32>
    %c1_113 = arith.constant 1 : index
    %c0_114 = arith.constant 0 : index
    %c0_115 = arith.constant 0 : index
    %189 = vector.load %arg11[%c1_113, %c0_114, %c0_115] : memref<2x1x32xf32, #tpu.memory_space<vmem>>, vector<1x1x32xf32>
    %190 = vector.shape_cast %189 : vector<1x1x32xf32> to vector<1x32xf32>
    %191 = vector.shape_cast %190 : vector<1x32xf32> to vector<1x32xf32>
    %192 = vector.broadcast %191 : vector<1x32xf32> to vector<8x32xf32>
    %193 = vector.extract_strided_slice %188 {offsets = [0, 0], sizes = [8, 32], strides = [1, 1]} : vector<16x32xf32> to vector<8x32xf32>
    %194 = vector.extract_strided_slice %188 {offsets = [8, 0], sizes = [8, 32], strides = [1, 1]} : vector<16x32xf32> to vector<8x32xf32>
    %195 = tpu.concatenate %192, %193, %192, %194 in 0 : vector<8x32xf32>, vector<8x32xf32>, vector<8x32xf32>, vector<8x32xf32> -> vector<32x32xf32>
    %196 = arith.truncf %188 : vector<16x32xf32> to vector<16x32xbf16>
    %197 = arith.truncf %195 : vector<32x32xf32> to vector<32x32xbf16>
    %c1_116 = arith.constant 1 : index
    %c0_117 = arith.constant 0 : index
    %c0_118 = arith.constant 0 : index
    %198 = vector.load %arg5[%c1_116, %c0_117, %c0_118] : memref<2x32x32xbf16, #tpu.memory_space<vmem>>, vector<1x32x32xbf16>
    %199 = vector.shape_cast %198 : vector<1x32x32xbf16> to vector<32x32xbf16>
    %cst_119 = arith.constant dense<0.000000e+00> : vector<16x32xf32>
    %200 = tpu.matmul %196, %199, %cst_119 {dimension_numbers = #tpu.dot_dimension_numbers<[1], [0], [0], [1], [0, 0, 1, 1], [], []>} : vector<16x32xbf16>, vector<32x32xbf16>, vector<16x32xf32> -> vector<16x32xf32>
    %c1_120 = arith.constant 1 : index
    %c0_121 = arith.constant 0 : index
    %c0_122 = arith.constant 0 : index
    %201 = vector.load %arg6[%c1_120, %c0_121, %c0_122] : memref<2x32x32xbf16, #tpu.memory_space<vmem>>, vector<1x32x32xbf16>
    %202 = vector.shape_cast %201 : vector<1x32x32xbf16> to vector<32x32xbf16>
    %cst_123 = arith.constant dense<0.000000e+00> : vector<32x32xf32>
    %203 = tpu.matmul %197, %202, %cst_123 {dimension_numbers = #tpu.dot_dimension_numbers<[1], [0], [0], [1], [0, 0, 1, 1], [], []>} : vector<32x32xbf16>, vector<32x32xbf16>, vector<32x32xf32> -> vector<32x32xf32>
    %c1_124 = arith.constant 1 : index
    %c0_125 = arith.constant 0 : index
    %c0_126 = arith.constant 0 : index
    %204 = vector.load %arg7[%c1_124, %c0_125, %c0_126] : memref<2x32x32xbf16, #tpu.memory_space<vmem>>, vector<1x32x32xbf16>
    %205 = vector.shape_cast %204 : vector<1x32x32xbf16> to vector<32x32xbf16>
    %cst_127 = arith.constant dense<0.000000e+00> : vector<32x32xf32>
    %206 = tpu.matmul %197, %205, %cst_127 {dimension_numbers = #tpu.dot_dimension_numbers<[1], [0], [0], [1], [0, 0, 1, 1], [], []>} : vector<32x32xbf16>, vector<32x32xbf16>, vector<32x32xf32> -> vector<32x32xf32>
    %c1_128 = arith.constant 1 : index
    %c0_129 = arith.constant 0 : index
    %c0_130 = arith.constant 0 : index
    %207 = vector.load %arg8[%c1_128, %c0_129, %c0_130] : memref<2x32x32xbf16, #tpu.memory_space<vmem>>, vector<1x32x32xbf16>
    %208 = vector.shape_cast %207 : vector<1x32x32xbf16> to vector<32x32xbf16>
    %cst_131 = arith.constant dense<0.000000e+00> : vector<32x32xf32>
    %209 = tpu.matmul %5, %208, %cst_131 {dimension_numbers = #tpu.dot_dimension_numbers<[1], [0], [0], [1], [0, 0, 1, 1], [], []>} : vector<32x32xbf16>, vector<32x32xbf16>, vector<32x32xf32> -> vector<32x32xf32>
    %210 = arith.truncf %203 : vector<32x32xf32> to vector<32x32xbf16>
    %211 = arith.truncf %206 : vector<32x32xf32> to vector<32x32xbf16>
    %212 = arith.truncf %209 : vector<32x32xf32> to vector<32x32xbf16>
    %213 = tpu.concatenate %210, %210, %210, %210 in 0 : vector<32x32xbf16>, vector<32x32xbf16>, vector<32x32xbf16>, vector<32x32xbf16> -> vector<128x32xbf16>
    %214 = arith.mulf %213, %1 : vector<128x32xbf16>
    %215 = tpu.concatenate %211, %211, %211, %211 in 0 : vector<32x32xbf16>, vector<32x32xbf16>, vector<32x32xbf16>, vector<32x32xbf16> -> vector<128x32xbf16>
    %216 = arith.mulf %215, %1 : vector<128x32xbf16>
    %217 = tpu.concatenate %212, %212, %212, %212 in 0 : vector<32x32xbf16>, vector<32x32xbf16>, vector<32x32xbf16>, vector<32x32xbf16> -> vector<128x32xbf16>
    %218 = arith.mulf %217, %1 : vector<128x32xbf16>
    %219 = vector.broadcast %3 : vector<1x32xf32> to vector<16x32xf32>
    %220 = arith.addf %200, %219 : vector<16x32xf32>
    %221 = arith.truncf %220 : vector<16x32xf32> to vector<16x32xbf16>
    %cst_132 = arith.constant dense<0.000000e+00> : vector<16x128xf32>
    %222 = tpu.matmul %221, %214, %cst_132 {dimension_numbers = #tpu.dot_dimension_numbers<[1], [1], [0], [0], [0, 0, 1, 0], [], []>} : vector<16x32xbf16>, vector<128x32xbf16>, vector<16x128xf32> -> vector<16x128xf32>
    %223 = vector.broadcast %4 : vector<1x32xf32> to vector<16x32xf32>
    %224 = arith.addf %200, %223 : vector<16x32xf32>
    %225 = arith.truncf %224 : vector<16x32xf32> to vector<16x32xbf16>
    %cst_133 = arith.constant dense<0.000000e+00> : vector<16x128xf32>
    %226 = tpu.matmul %225, %218, %cst_133 {dimension_numbers = #tpu.dot_dimension_numbers<[1], [1], [0], [0], [0, 0, 1, 0], [], []>} : vector<16x32xbf16>, vector<128x32xbf16>, vector<16x128xf32> -> vector<16x128xf32>
    %c0_134 = arith.constant 0 : index
    %c0_135 = arith.constant 0 : index
    %c0_136 = arith.constant 0 : index
    %227 = vector.load %arg21[%c0_134, %c0_135, %c0_136] : memref<3x128x128xf32, #tpu.memory_space<vmem>>, vector<1x128x128xf32>
    %228 = vector.shape_cast %227 : vector<1x128x128xf32> to vector<128x128xf32>
    %cst_137 = arith.constant dense<0.000000e+00> : vector<16x128xf32>
    %229 = tpu.matmul %226, %228, %cst_137 {dimension_numbers = #tpu.dot_dimension_numbers<[1], [0], [0], [1], [0, 0, 1, 1], [], []>} : vector<16x128xf32>, vector<128x128xf32>, vector<16x128xf32> -> vector<16x128xf32>
    %c0_138 = arith.constant 0 : index
    %c0_139 = arith.constant 0 : index
    %c0_140 = arith.constant 0 : index
    %230 = vector.load %arg22[%c0_138, %c0_139, %c0_140] : memref<3x16x128xf32, #tpu.memory_space<vmem>>, vector<1x16x128xf32>
    %231 = vector.shape_cast %230 : vector<1x16x128xf32> to vector<16x128xf32>
    %cst_141 = arith.constant 5.000000e-01 : f32
    %232 = vector.broadcast %cst_141 : f32 to vector<16x128xf32>
    %233 = arith.cmpf ogt, %231, %232 : vector<16x128xf32>
    %234 = arith.select %233, %229, %226 : vector<16x128xi1>, vector<16x128xf32>
    %c1_142 = arith.constant 1 : index
    %c0_143 = arith.constant 0 : index
    %c0_144 = arith.constant 0 : index
    %235 = vector.load %arg21[%c1_142, %c0_143, %c0_144] : memref<3x128x128xf32, #tpu.memory_space<vmem>>, vector<1x128x128xf32>
    %236 = vector.shape_cast %235 : vector<1x128x128xf32> to vector<128x128xf32>
    %cst_145 = arith.constant dense<0.000000e+00> : vector<16x128xf32>
    %237 = tpu.matmul %234, %236, %cst_145 {dimension_numbers = #tpu.dot_dimension_numbers<[1], [0], [0], [1], [0, 0, 1, 1], [], []>} : vector<16x128xf32>, vector<128x128xf32>, vector<16x128xf32> -> vector<16x128xf32>
    %c1_146 = arith.constant 1 : index
    %c0_147 = arith.constant 0 : index
    %c0_148 = arith.constant 0 : index
    %238 = vector.load %arg22[%c1_146, %c0_147, %c0_148] : memref<3x16x128xf32, #tpu.memory_space<vmem>>, vector<1x16x128xf32>
    %239 = vector.shape_cast %238 : vector<1x16x128xf32> to vector<16x128xf32>
    %cst_149 = arith.constant 5.000000e-01 : f32
    %240 = vector.broadcast %cst_149 : f32 to vector<16x128xf32>
    %241 = arith.cmpf ogt, %239, %240 : vector<16x128xf32>
    %242 = arith.select %241, %237, %234 : vector<16x128xi1>, vector<16x128xf32>
    %c2_150 = arith.constant 2 : index
    %c0_151 = arith.constant 0 : index
    %c0_152 = arith.constant 0 : index
    %243 = vector.load %arg21[%c2_150, %c0_151, %c0_152] : memref<3x128x128xf32, #tpu.memory_space<vmem>>, vector<1x128x128xf32>
    %244 = vector.shape_cast %243 : vector<1x128x128xf32> to vector<128x128xf32>
    %cst_153 = arith.constant dense<0.000000e+00> : vector<16x128xf32>
    %245 = tpu.matmul %242, %244, %cst_153 {dimension_numbers = #tpu.dot_dimension_numbers<[1], [0], [0], [1], [0, 0, 1, 1], [], []>} : vector<16x128xf32>, vector<128x128xf32>, vector<16x128xf32> -> vector<16x128xf32>
    %c2_154 = arith.constant 2 : index
    %c0_155 = arith.constant 0 : index
    %c0_156 = arith.constant 0 : index
    %246 = vector.load %arg22[%c2_154, %c0_155, %c0_156] : memref<3x16x128xf32, #tpu.memory_space<vmem>>, vector<1x16x128xf32>
    %247 = vector.shape_cast %246 : vector<1x16x128xf32> to vector<16x128xf32>
    %cst_157 = arith.constant 5.000000e-01 : f32
    %248 = vector.broadcast %cst_157 : f32 to vector<16x128xf32>
    %249 = arith.cmpf ogt, %247, %248 : vector<16x128xf32>
    %250 = arith.select %249, %245, %242 : vector<16x128xi1>, vector<16x128xf32>
    %251 = arith.addf %222, %250 : vector<16x128xf32>
    %cst_158 = arith.constant 0.353553385 : f32
    %252 = vector.broadcast %cst_158 : f32 to vector<16x128xf32>
    %253 = arith.mulf %251, %252 : vector<16x128xf32>
    %254 = arith.addf %253, %2 : vector<16x128xf32>
    %cst_159 = arith.constant dense<0xFF800000> : vector<16xf32>
    %255 = vector.multi_reduction <maximumf>, %254, %cst_159 [1] : vector<16x128xf32> to vector<16xf32>
    %256 = vector.shape_cast %255 : vector<16xf32> to vector<16x1xf32>
    %257 = vector.broadcast %256 : vector<16x1xf32> to vector<16x128xf32>
    %258 = arith.subf %254, %257 : vector<16x128xf32>
    %259 = math.exp %258 : vector<16x128xf32>
    %cst_160 = arith.constant dense<0.000000e+00> : vector<16x32xf32>
    %260 = tpu.matmul %259, %0, %cst_160 {dimension_numbers = #tpu.dot_dimension_numbers<[1], [0], [0], [1], [0, 0, 1, 1], [], []>} : vector<16x128xf32>, vector<128x32xf32>, vector<16x32xf32> -> vector<16x32xf32>
    %261 = arith.truncf %259 : vector<16x128xf32> to vector<16x128xbf16>
    %cst_161 = arith.constant dense<0.000000e+00> : vector<16x32xf32>
    %262 = tpu.matmul %261, %216, %cst_161 {dimension_numbers = #tpu.dot_dimension_numbers<[1], [0], [0], [1], [0, 0, 1, 1], [], []>} : vector<16x128xbf16>, vector<128x32xbf16>, vector<16x32xf32> -> vector<16x32xf32>
    %263 = tpu.reciprocal %260 {approx = true} : vector<16x32xf32> -> vector<16x32xf32>
    %264 = arith.mulf %262, %263 : vector<16x32xf32>
    %265 = arith.truncf %264 : vector<16x32xf32> to vector<16x32xbf16>
    %c1_162 = arith.constant 1 : index
    %c0_163 = arith.constant 0 : index
    %c0_164 = arith.constant 0 : index
    %266 = vector.load %arg9[%c1_162, %c0_163, %c0_164] : memref<2x32x32xbf16, #tpu.memory_space<vmem>>, vector<1x32x32xbf16>
    %267 = vector.shape_cast %266 : vector<1x32x32xbf16> to vector<32x32xbf16>
    %cst_165 = arith.constant dense<0.000000e+00> : vector<16x32xf32>
    %268 = tpu.matmul %265, %267, %cst_165 {dimension_numbers = #tpu.dot_dimension_numbers<[1], [0], [0], [1], [0, 0, 1, 1], [], []>} : vector<16x32xbf16>, vector<32x32xbf16>, vector<16x32xf32> -> vector<16x32xf32>
    %269 = arith.addf %162, %268 : vector<16x32xf32>
    %c1_166 = arith.constant 1 : index
    %c0_167 = arith.constant 0 : index
    %c0_168 = arith.constant 0 : index
    %270 = vector.load %arg16[%c1_166, %c0_167, %c0_168] : memref<2x1x32xf32, #tpu.memory_space<vmem>>, vector<1x1x32xf32>
    %271 = vector.shape_cast %270 : vector<1x1x32xf32> to vector<1x32xf32>
    %c1_169 = arith.constant 1 : index
    %c0_170 = arith.constant 0 : index
    %c0_171 = arith.constant 0 : index
    %272 = vector.load %arg17[%c1_169, %c0_170, %c0_171] : memref<2x1x32xf32, #tpu.memory_space<vmem>>, vector<1x1x32xf32>
    %273 = vector.shape_cast %272 : vector<1x1x32xf32> to vector<1x32xf32>
    %cst_172 = arith.constant dense<0.000000e+00> : vector<16xf32>
    %274 = vector.multi_reduction <add>, %269, %cst_172 [1] : vector<16x32xf32> to vector<16xf32>
    %275 = vector.shape_cast %274 : vector<16xf32> to vector<16x1xf32>
    %cst_173 = arith.constant 3.200000e+01 : f32
    %276 = vector.broadcast %cst_173 : f32 to vector<16x1xf32>
    %277 = arith.divf %275, %276 : vector<16x1xf32>
    %278 = vector.broadcast %277 : vector<16x1xf32> to vector<16x32xf32>
    %279 = arith.subf %269, %278 : vector<16x32xf32>
    %280 = arith.mulf %279, %279 : vector<16x32xf32>
    %cst_174 = arith.constant dense<0.000000e+00> : vector<16xf32>
    %281 = vector.multi_reduction <add>, %280, %cst_174 [1] : vector<16x32xf32> to vector<16xf32>
    %282 = vector.shape_cast %281 : vector<16xf32> to vector<16x1xf32>
    %cst_175 = arith.constant 3.200000e+01 : f32
    %283 = vector.broadcast %cst_175 : f32 to vector<16x1xf32>
    %284 = arith.divf %282, %283 : vector<16x1xf32>
    %285 = vector.broadcast %277 : vector<16x1xf32> to vector<16x32xf32>
    %286 = arith.subf %269, %285 : vector<16x32xf32>
    %cst_176 = arith.constant 1.000000e-03 : f32
    %287 = vector.broadcast %cst_176 : f32 to vector<16x1xf32>
    %288 = arith.addf %284, %287 : vector<16x1xf32>
    %289 = math.rsqrt %288 : vector<16x1xf32>
    %290 = vector.broadcast %289 : vector<16x1xf32> to vector<16x32xf32>
    %291 = arith.mulf %286, %290 : vector<16x32xf32>
    %292 = vector.broadcast %271 : vector<1x32xf32> to vector<16x32xf32>
    %293 = arith.mulf %291, %292 : vector<16x32xf32>
    %294 = vector.broadcast %273 : vector<1x32xf32> to vector<16x32xf32>
    %295 = arith.addf %293, %294 : vector<16x32xf32>
    %296 = arith.truncf %295 : vector<16x32xf32> to vector<16x32xbf16>
    %c1_177 = arith.constant 1 : index
    %c0_178 = arith.constant 0 : index
    %c0_179 = arith.constant 0 : index
    %297 = vector.load %arg12[%c1_177, %c0_178, %c0_179] : memref<2x32x64xbf16, #tpu.memory_space<vmem>>, vector<1x32x64xbf16>
    %298 = vector.shape_cast %297 : vector<1x32x64xbf16> to vector<32x64xbf16>
    %cst_180 = arith.constant dense<0.000000e+00> : vector<16x64xf32>
    %299 = tpu.matmul %296, %298, %cst_180 {dimension_numbers = #tpu.dot_dimension_numbers<[1], [0], [0], [1], [0, 0, 1, 1], [], []>} : vector<16x32xbf16>, vector<32x64xbf16>, vector<16x64xf32> -> vector<16x64xf32>
    %c1_181 = arith.constant 1 : index
    %c0_182 = arith.constant 0 : index
    %c0_183 = arith.constant 0 : index
    %300 = vector.load %arg13[%c1_181, %c0_182, %c0_183] : memref<2x1x64xf32, #tpu.memory_space<vmem>>, vector<1x1x64xf32>
    %301 = vector.shape_cast %300 : vector<1x1x64xf32> to vector<1x64xf32>
    %302 = vector.broadcast %301 : vector<1x64xf32> to vector<16x64xf32>
    %303 = arith.addf %299, %302 : vector<16x64xf32>
    %cst_184 = arith.constant 0.000000e+00 : f32
    %304 = vector.broadcast %cst_184 : f32 to vector<16x64xf32>
    %305 = arith.maximumf %303, %304 : vector<16x64xf32>
    %306 = arith.truncf %305 : vector<16x64xf32> to vector<16x64xbf16>
    %c1_185 = arith.constant 1 : index
    %c0_186 = arith.constant 0 : index
    %c0_187 = arith.constant 0 : index
    %307 = vector.load %arg14[%c1_185, %c0_186, %c0_187] : memref<2x64x32xbf16, #tpu.memory_space<vmem>>, vector<1x64x32xbf16>
    %308 = vector.shape_cast %307 : vector<1x64x32xbf16> to vector<64x32xbf16>
    %cst_188 = arith.constant dense<0.000000e+00> : vector<16x32xf32>
    %309 = tpu.matmul %306, %308, %cst_188 {dimension_numbers = #tpu.dot_dimension_numbers<[1], [0], [0], [1], [0, 0, 1, 1], [], []>} : vector<16x64xbf16>, vector<64x32xbf16>, vector<16x32xf32> -> vector<16x32xf32>
    %c1_189 = arith.constant 1 : index
    %c0_190 = arith.constant 0 : index
    %c0_191 = arith.constant 0 : index
    %310 = vector.load %arg15[%c1_189, %c0_190, %c0_191] : memref<2x1x32xf32, #tpu.memory_space<vmem>>, vector<1x1x32xf32>
    %311 = vector.shape_cast %310 : vector<1x1x32xf32> to vector<1x32xf32>
    %312 = vector.broadcast %311 : vector<1x32xf32> to vector<16x32xf32>
    %313 = arith.addf %309, %312 : vector<16x32xf32>
    %314 = arith.addf %269, %313 : vector<16x32xf32>
    %315 = arith.truncf %314 : vector<16x32xf32> to vector<16x32xbf16>
    %c0_192 = arith.constant 0 : index
    %c0_193 = arith.constant 0 : index
    %316 = vector.load %arg18[%c0_192, %c0_193] : memref<32x128xbf16, #tpu.memory_space<vmem>>, vector<32x128xbf16>
    %cst_194 = arith.constant dense<0.000000e+00> : vector<16x128xf32>
    %317 = tpu.matmul %315, %316, %cst_194 {dimension_numbers = #tpu.dot_dimension_numbers<[1], [0], [0], [1], [0, 0, 1, 1], [], []>} : vector<16x32xbf16>, vector<32x128xbf16>, vector<16x128xf32> -> vector<16x128xf32>
    %c0_195 = arith.constant 0 : index
    %c0_196 = arith.constant 0 : index
    %318 = vector.load %arg19[%c0_195, %c0_196] : memref<1x128xf32, #tpu.memory_space<vmem>>, vector<1x128xf32>
    %319 = vector.broadcast %318 : vector<1x128xf32> to vector<16x128xf32>
    %320 = arith.addf %317, %319 : vector<16x128xf32>
    %c0_197 = arith.constant 0 : index
    %c0_198 = arith.constant 0 : index
    %321 = vector.load %arg24[%c0_197, %c0_198] : memref<16x128xf32, #tpu.memory_space<vmem>>, vector<16x128xf32>
    tpu.vector_store %arg24[%c0_197, %c0_198], %320 {strides = array<i32>} : memref<16x128xf32, #tpu.memory_space<vmem>>, vector<16x128xf32>,
    return
  }
}

</mosaic_0001>

<bundles_post_ra>
// kernel: eq.70
= control target key start
LH: loop header
LB: loop body
LE: loop exit
PB: predicated region body
PF: predicated region fallthrough
CT: control target
= control target key end

     0   :  { %vm7_vm0 = vcmask 64512   ;;  %vm13_vm1 = vcmask 130112   ;;  %s39_s0 = inlined_call_operand.vmem [shape: s32[2,8], index: 0, kind: input, shape index: {}]   ;;  %s40_s1 = inlined_call_operand.vmem [shape: s32[16], index: 1, kind: output, shape index: {}]  }
   0x1   :  { %v4_v0 = vld [vmem:[%s39_s0] sm:$0x3]  ;;  %s22_s0 = smov 8  }
   0x2   :  { %5 = vst [vmem:[#allocation1] sm:$0x3] %v4_v0 }
   0x9   :  { %v10_v1 = vld [vmem:[#allocation1 + $0x1] sm:$0x1]   ;;  %v6_v2 = vld [vmem:[#allocation1] sm:$0x1]  }
   0xa   :  { %11 = vrot.lane.b32.xlu0 %v10_v1, %s22_s0  ;;  %8 = vst.msk [vmem:[#allocation0] sm:$0x1] %vm7_vm0, %v6_v2  }
  0x7c   :  { %v12_v3 = vpop.permute.xlu0 %11  }
  0x7d   :  { %14 = vst.msk [vmem:[#allocation0] sm:$0x1] %vm13_vm1, %v12_v3  }
  0x84   :  { %v17_v4 = vld [vmem:[#allocation0] sm:$0x1] }
  0x85   :  { %20 = vst [vmem:[%s40_s1] sm:$0x1] %v17_v4 }

// kernel: model_forward.1
= control target key start
LH: loop header
LB: loop body
LE: loop exit
PB: predicated region body
PF: predicated region fallthrough
CT: control target
= control target key end

     0   :  { %vm157_vm0 = vcmask 523264   ;;  %vm179_vm1 = vcmask 261120   ;;  %v2225_v11 = vmov 32.0   ;;  %s3489_s1 = inlined_call_operand.vmem [shape: bf16[64,32], index: 1, kind: input, shape index: {}]   ;;  %s3490_s0 = inlined_call_operand.vmem [shape: bf16[16,64], index: 0, kind: input, shape index: {}]   ;;  %s3491_s10 = inlined_call_operand.vmem [shape: f32[2,1,32], index: 10, kind: input, shape index: {}]   ;;  %s3492_s11 = inlined_call_operand.vmem [shape: f32[2,1,32], index: 11, kind: input, shape index: {}]   ;;  %s3493_s6 = inlined_call_operand.vmem [shape: bf16[2,32,32], index: 6, kind: input, shape index: {}]   ;;  %s3494_s7 = inlined_call_operand.vmem [shape: bf16[2,32,32], index: 7, kind: input, shape index: {}]   ;;  %s3495_s5 = inlined_call_operand.vmem [shape: bf16[2,32,32], index: 5, kind: input, shape index: {}]   ;;  %s3496_s8 = inlined_call_operand.vmem [shape: bf16[2,32,32], index: 8, kind: input, shape index: {}]   ;;  %s3497_s3 = inlined_call_operand.vmem [shape: f32[1,32], index: 3, kind: input, shape index: {}]   ;;  %s3498_s4 = inlined_call_operand.vmem [shape: f32[1,32], index: 4, kind: input, shape index: {}]   ;;  %s3499_s2 = inlined_call_operand.vmem [shape: bf16[32,32], index: 2, kind: input, shape index: {}]   ;;  %s3500_s21 = inlined_call_operand.vmem [shape: f32[3,128,128], index: 21, kind: input, shape index: {}]   ;;  %s3501_s23 = inlined_call_operand.vmem [shape: f32[128,32], index: 23, kind: input, shape index: {}]   ;;  %s3502_s22 = inlined_call_operand.vmem [shape: f32[3,16,128], index: 22, kind: input, shape index: {}]   ;;  %s3503_s20 = inlined_call_operand.vmem [shape: f32[16,128], index: 20, kind: input, shape index: {}]   ;;  %s3504_s9 = inlined_call_operand.vmem [shape: bf16[2,32,32], index: 9, kind: input, shape index: {}]   ;;  %s3505_s16 = inlined_call_operand.vmem [shape: f32[2,1,32], index: 16, kind: input, shape index: {}]   ;;  %s3506_s17 = inlined_call_operand.vmem [shape: f32[2,1,32], index: 17, kind: input, shape index: {}]   ;;  %s3507_s13 = inlined_call_operand.vmem [shape: f32[2,1,64], index: 13, kind: input, shape index: {}]   ;;  %s3508_s12 = inlined_call_operand.vmem [shape: bf16[2,32,64], index: 12, kind: input, shape index: {}]   ;;  %s3509_s14 = inlined_call_operand.vmem [shape: bf16[2,64,32], index: 14, kind: input, shape index: {}]   ;;  %s3510_s15 = inlined_call_operand.vmem [shape: f32[2,1,32], index: 15, kind: input, shape index: {}]   ;;  %s3511_s18 = inlined_call_operand.vmem [shape: bf16[32,128], index: 18, kind: input, shape index: {}]   ;;  %s3512_s19 = inlined_call_operand.vmem [shape: f32[1,128], index: 19, kind: input, shape index: {}]   ;;  %s3513_s24 = inlined_call_operand.vmem [shape: f32[16,128], index: 24, kind: output, shape index: {}]  }
   0x1   :  { %3533 = sst [smem:[#allocation11_spill]] %s3489_s1  ;;  %2149 = vrcp.f32 %v2225_v11  ;;  %v1928_v11 = vld [vmem:[%s3500_s21 + $0x168] sm:$0xff] }
   0x2   :  { %3534 = sst [smem:[#allocation12_spill]] %s3490_s0 }
   0x3   :  { %3535 = sst [smem:[#allocation13_spill]] %s3491_s10 }
   0x4   :  { %3536 = sst [smem:[#allocation14_spill]] %s3492_s11 }
   0x5   :  { %3537 = sst [smem:[#allocation15_spill]] %s3493_s6 }
   0x6   :  { %3538 = sst [smem:[#allocation16_spill]] %s3494_s7 }
   0x7   :  { %3539 = sst [smem:[#allocation17_spill]] %s3495_s5  ;;  %v2150_v12 = vpop.eup %2149 }
   0x8   :  { %3540 = sst [smem:[#allocation18_spill]] %s3496_s8  ;;  %v187_v13 = vmul.f32 32.0, %v2150_v12  ;;  %vm191_vm2 = vweird.f32 %v2150_v12 }
   0x9   :  { %3541 = sst [smem:[#allocation19_spill]] %s3497_s3 }
   0xa   :  { %3542 = sst [smem:[#allocation20_spill]] %s3512_s19  ;;  %v188_v14 = vsub.f32 1.0, %v187_v13  ;;  %v1927_v13 = vld [vmem:[%s3500_s21 + $0x160] sm:$0xff] }
   0xb   :  { %3543 = sst [smem:[#allocation21_spill]] %s3513_s24 }
   0xc   :  { %s3544_s27 = sld [smem:[#allocation11_spill]]  ;;  %v189_v15 = vmul.f32 %v2150_v12, %v188_v14  ;;  %v617_v14 = vld [vmem:[%s3500_s21 + $0x60] sm:$0xff] }
   0xd   :  { %s3545_s11 = sld [smem:[#allocation12_spill]] }
   0xe   :  { %v190_v16 = vadd.f32 %v2150_v12, %v189_v15  ;;  %s3546_s0 = sld [smem:[#allocation15_spill]]  ;;  %v1926_v15 = vld [vmem:[%s3500_s21 + $0x158] sm:$0xff] }
   0xf   :  { %s3548_s30 = sld [smem:[#allocation17_spill]] }
  0x10   :  { %v2375_v17 = vsel %vm191_vm2, %v2150_v12, %v190_v16  ;;  %s3549_s7 = sld [smem:[#allocation18_spill]]  ;;  %v618_v12 = vld [vmem:[%s3500_s21 + $0x68] sm:$0xff]  ;;  %v616_v16 = vld [vmem:[%s3500_s21 + $0x58] sm:$0xff] }
  0x11   :  { %s3550_s29 = sld [smem:[#allocation13_spill]] }
  0x12   :  { %v2098_v0 = vld [vmem:[%s3544_s27 + $0x18] sm:$0xff]  ;;  %v2097_v1 = vld [vmem:[%s3544_s27 + $0x10] sm:$0xff]  ;;  %v2096_v2 = vld [vmem:[%s3544_s27 + $0x8] sm:$0xff]  ;;  %s3551_s3 = sld [smem:[#allocation14_spill]] }
  0x13   :  { %165 = vmatpush.bf16.msra.mxu0 %v2098_v0  ;;  %v2095_v3 = vld [vmem:[%s3544_s27] sm:$0xff]  ;;  %s3547_s27 = sld [smem:[#allocation16_spill]] }
  0x14   :  { %v2094_v4 = vld [vmem:[%s3545_s11] sm:$0xff]  ;;  %v2102_v28 = vld [vmem:[%s3546_s0 + $0x8] sm:$0xff]  ;;  %s3552_s25 = sld [smem:[#allocation19_spill]] }
  0x15   :  { %305 = vmatpush.bf16.msra.mxu2 %v2102_v28  ;;  %v2101_v30 = vld [vmem:[%s3546_s0] sm:$0xff]  ;;  %v2100_v32 = vld [vmem:[%s3548_s30 + $0x8] sm:$0xff] }
  0x16   :  { %269 = vmatpush.bf16.msra.mxu1 %v2100_v32  ;;  %v2099_v34 = vld [vmem:[%s3548_s30] sm:$0xff]  ;;  %v2106_v37 = vld [vmem:[%s3549_s7 + $0x8] sm:$0xff]  ;;  %v1918_v32 = vld [vmem:[%s3500_s21 + $0x118] sm:$0xff] }
  0x17   :  { %166 = vmatpush.bf16.msra.mxu0 %v2097_v1  ;;  %v2105_v44 = vld [vmem:[%s3549_s7] sm:$0xff]  ;;  %v1920_v28 = vld [vmem:[%s3500_s21 + $0x128] sm:$0xff] }
  0x18   :  { %v2134_v50 = vld [vmem:[%s3550_s29] ss:$0 sm:$0xff] }
  0x19   :  { %v2104_v29 = vld [vmem:[%s3547_s27 + $0x8] sm:$0xff]  ;;  %v2103_v31 = vld [vmem:[%s3547_s27] sm:$0xff]  ;;  %306 = vmatpush.bf16.msra.mxu2 %v2101_v30 }
  0x1a   :  { %340 = vmatpush.bf16.msra.mxu3 %v2104_v29  ;;  %270 = vmatpush.bf16.msra.mxu1 %v2099_v34  ;;  %v2135_v54 = vld [vmem:[%s3551_s3] ss:$0 sm:$0xff]  ;;  %v610_v29 = vld [vmem:[%s3500_s21 + $0x28] sm:$0xff] }
  0x1b   :  { %167 = vmatpush.bf16.msra.mxu0 %v2096_v2  ;;  %v1919_v30 = vld [vmem:[%s3500_s21 + $0x120] sm:$0xff] }
  0x1e   :  { %341 = vmatpush.bf16.msra.mxu3 %v2103_v31  ;;  %391 = vmatpush.bf16.msrb.mxu1 %v2106_v37  ;;  %v609_v31 = vld [vmem:[%s3500_s21 + $0x20] sm:$0xff]  ;;  %v607_v37 = vld [vmem:[%s3500_s21 + $0x10] sm:$0xff] }
  0x1f   :  { %168 = vmatpush.bf16.msra.mxu0 %v2095_v3  ;;  %v2092_v3 = vld [vmem:[%s3499_s2] sm:$0xff] }
  0x22   :  { %1848 = vmatmul.msk.bf16.vlgmr.msra.gmra.mxu0 %vm157_vm0, %v2094_v4  ;;  %392 = vmatpush.bf16.msrb.mxu1 %v2105_v44  ;;  %v2093_v4 = vld [vmem:[%s3499_s2 + $0x8] sm:$0xff]  ;;  %v2139_v44 = vld [vmem:[%s3498_s4] ss:$0 sm:$0xff] }
  0x9f   :  { %v170_v5 = vpop.f32.mrf.mxu0 }
  0xa0   :  { %v2367_v6 = vmul.f32 5.656854, %v170_v5  ;;  %v1930_v5 = vld [vmem:[%s3500_s21 + $0x178] sm:$0xff] }
  0xa2   :  { %v180_v7 = vsel %vm179_vm1, %v2367_v6, 0.0 }
  0xa3   :  { %181 = vadd.xlane.f32.xlu0 %v180_v7  ;;  %v620_v7 = vld [vmem:[%s3500_s21 + $0x78] sm:$0xff] }
  0xa4   :  { %621 = vmatpush.msrb.mxu3 %v620_v7 }
  0xa7   :  { %v172_v8 = vpop.f32.mrf.mxu0 }
  0xa8   :  { %v2371_v9 = vmul.f32 5.656854, %v172_v8  ;;  %v1929_v8 = vld [vmem:[%s3500_s21 + $0x170] sm:$0xff] }
  0xaa   :  { %v183_v10 = vsel %vm179_vm1, %v2371_v9, 0.0 }
  0xab   :  { %184 = vadd.xlane.f32.xlu0 %v183_v10  ;;  %v619_v10 = vld [vmem:[%s3500_s21 + $0x70] sm:$0xff] }
  0xac   :  { %622 = vmatpush.msrb.mxu3 %v619_v10 }
  0xae   :  { %623 = vmatpush.msrb.mxu3 %v618_v12 }
  0xb0   :  { %624 = vmatpush.msrb.mxu3 %v617_v14 }
  0xb2   :  { %625 = vmatpush.msrb.mxu3 %v616_v16 }
 0x116   :  { %v182_v18 = vpop.xlane.xlu0 %181 }
 0x117   :  { %v193_v19 = vmul.f32 %v2375_v17, %v182_v18  ;;  %v1925_v18 = vld [vmem:[%s3500_s21 + $0x150] sm:$0xff] }
 0x119   :  { %v195_v20 = vsub.f32 %v2367_v6, %v193_v19  ;;  %v615_v19 = vld [vmem:[%s3500_s21 + $0x50] sm:$0xff] }
 0x11a   :  { %626 = vmatpush.msrb.mxu3 %v615_v19 }
 0x11b   :  { %v197_v21 = vmul.f32 %v195_v20, %v195_v20 }
 0x11d   :  { %v199_v22 = vsel %vm179_vm1, %v197_v21, 0.0  ;;  %v614_v21 = vld [vmem:[%s3500_s21 + $0x48] sm:$0xff] }
 0x11e   :  { %200 = vadd.xlane.f32.xlu1 %v199_v22  ;;  %v185_v23 = vpop.xlane.xlu0 %184  ;;  %627 = vmatpush.msrb.mxu3 %v614_v21  ;;  %v1923_v22 = vld [vmem:[%s3500_s21 + $0x140] sm:$0xff] }
 0x11f   :  { %v194_v24 = vmul.f32 %v2375_v17, %v185_v23  ;;  %v613_v23 = vld [vmem:[%s3500_s21 + $0x40] sm:$0xff] }
 0x120   :  { %628 = vmatpush.msrb.mxu3 %v613_v23 }
 0x121   :  { %v196_v25 = vsub.f32 %v2371_v9, %v194_v24  ;;  %v1922_v24 = vld [vmem:[%s3500_s21 + $0x138] sm:$0xff] }
 0x123   :  { %v198_v26 = vmul.f32 %v196_v25, %v196_v25 }
 0x125   :  { %v202_v27 = vsel %vm179_vm1, %v198_v26, 0.0  ;;  %v1921_v26 = vld [vmem:[%s3500_s21 + $0x130] sm:$0xff] }
 0x126   :  { %203 = vadd.xlane.f32.xlu1 %v202_v27  ;;  %v611_v27 = vld [vmem:[%s3500_s21 + $0x30] sm:$0xff] }
 0x191   :  { %v201_v33 = vpop.xlane.xlu1 %200 }
 0x192   :  { %v205_v35 = vmul.f32 %v201_v33, %v2375_v17  ;;  %v608_v33 = vld [vmem:[%s3500_s21 + $0x18] sm:$0xff] }
 0x194   :  { %v207_v36 = vadd.f32 0.001, %v205_v35 }
 0x196   :  { %2151 = vrsqrt.f32 %v207_v36  ;;  %vm215_vm4 = vweird.f32 %v207_v36 }
 0x199   :  { %v204_v38 = vpop.xlane.xlu1 %203 }
 0x19a   :  { %v206_v39 = vmul.f32 %v204_v38, %v2375_v17 }
 0x19c   :  { %v2152_v40 = vpop.eup %2151  ;;  %v208_v41 = vadd.f32 0.001, %v206_v39  ;;  %v1916_v39 = vld [vmem:[%s3500_s21 + $0x108] sm:$0xff] }
 0x19d   :  { %v210_v42 = vmul.f32 %v2152_v40, %v207_v36  ;;  %vm216_vm3 = vweird.f32 %v2152_v40  ;;  %v1917_v36 = vld [vmem:[%s3500_s21 + $0x110] sm:$0xff] }
 0x19e   :  { %2153 = vrsqrt.f32 %v208_v41  ;;  %vm217_vm5 = vmor %vm215_vm4, %vm216_vm3  ;;  %vm225_vm7 = vweird.f32 %v208_v41 }
 0x19f   :  { %v211_v43 = vmul.f32 %v2152_v40, %v210_v42  ;;  %v605_v42 = vld [vmem:[%s3500_s21] sm:$0xff] }
 0x1a1   :  { %v212_v45 = vmul.f32 0.5, %v211_v43  ;;  %v2138_v43 = vld [vmem:[%s3552_s25] ss:$0 sm:$0xff] }
 0x1a3   :  { %v213_v46 = vsub.f32 1.5, %v212_v45 }
 0x1a4   :  { %v2154_v47 = vpop.eup %2153 }
 0x1a5   :  { %v214_v48 = vmul.f32 %v2152_v40, %v213_v46  ;;  %v220_v49 = vmul.f32 %v2154_v47, %v208_v41  ;;  %vm226_vm6 = vweird.f32 %v2154_v47  ;;  %v1915_v41 = vld [vmem:[%s3500_s21 + $0x100] sm:$0xff] }
 0x1a6   :  { %vm227_vm8 = vmor %vm225_vm7, %vm226_vm6 }
 0x1a7   :  { %v218_v51 = vsel %vm217_vm5, %v2152_v40, %v214_v48  ;;  %v221_v52 = vmul.f32 %v2154_v47, %v220_v49  ;;  %v606_v40 = vld [vmem:[%s3500_s21 + $0x8] sm:$0xff] }
 0x1a8   :  { %v229_v53 = vmul.f32 %v218_v51, %v195_v20  ;;  %v1924_v20 = vld [vmem:[%s3500_s21 + $0x148] sm:$0xff] }
 0x1a9   :  { %v222_v55 = vmul.f32 0.5, %v221_v52 }
 0x1aa   :  { %v234_v56 = vmul.f32 %v2134_v50, %v229_v53 }
 0x1ab   :  { %v223_v57 = vsub.f32 1.5, %v222_v55 }
 0x1ac   :  { %v239_v58 = vadd.f32 %v2135_v54, %v234_v56 }
 0x1ad   :  { %v224_v59 = vmul.f32 %v2154_v47, %v223_v57 }
 0x1ae   :  { %v242_v60 = vpack.c.bf16 %v239_v58, %v2135_v54 }
 0x1af   :  { %v228_v61 = vsel %vm227_vm8, %v2154_v47, %v224_v59 }
 0x1b0   :  { %v230_v62 = vmul.f32 %v228_v61, %v196_v25  ;;  %1866 = vmatmul.msk.bf16.vlgmr.msra.gmra.mxu2 %vm179_vm1, %v242_v60  ;;  %1876 = vmatmul.msk.bf16.vlgmr.msra.gmra.mxu3 %vm179_vm1, %v242_v60  ;;  %v612_v25 = vld [vmem:[%s3500_s21 + $0x38] sm:$0xff]  ;;  %v2547_v60 = vld [vmem:[%s3501_s23 + $0x60] sm:$0xff]  ;;  %v2552_v61 = vld [vmem:[%s3501_s23 + $0x68] sm:$0xff] }
 0x1b1   :  { %629 = vmatpush.msrb.mxu3 %v612_v25  ;;  %v106_v10 = vpack.c.bf16 %v2547_v60, %v2547_v60  ;;  %v2580_v25 = vld [vmem:[%s3501_s23 + $0x58] sm:$0xff] }
 0x1b2   :  { %v235_v63 = vmul.f32 %v2134_v50, %v230_v62 }
 0x1b3   :  { %630 = vmatpush.msrb.mxu3 %v611_v27  ;;  %v2582_v27 = vunpack.c.l.bf16 %v106_v10 }
 0x1b4   :  { %v240_v0 = vadd.f32 %v2135_v54, %v235_v63 }
 0x1b5   :  { %631 = vmatpush.msrb.mxu3 %v610_v29 }
 0x1b6   :  { %v241_v1 = vpack.c.bf16 %v240_v0, %v239_v58  ;;  %v243_v2 = vpack.c.bf16 %v240_v0, %v2135_v54  ;;  %v2557_v0 = vld [vmem:[%s3501_s23 + $0x70] sm:$0xff] }
 0x1b7   :  { %632 = vmatpush.msrb.mxu3 %v609_v31  ;;  %v108_v14 = vpack.c.bf16 %v2557_v0, %v2557_v0 }
 0x1b8   :  { %1857 = vmatmul.msk.bf16.vlgmr.msra.gmra.mxu1 %vm179_vm1, %v241_v1  ;;  %v2562_v1 = vld [vmem:[%s3501_s23 + $0x78] sm:$0xff] }
 0x1b9   :  { %714 = vmatpush.msra.mxu1 %v1930_v5  ;;  %633 = vmatpush.msrb.mxu3 %v608_v33  ;;  %v2586_v31 = vunpack.c.l.bf16 %v108_v14 }
 0x1bb   :  { %715 = vmatpush.msra.mxu1 %v1929_v8  ;;  %634 = vmatpush.msrb.mxu3 %v607_v37  ;;  %3553 = vst [vmem:[#allocation2_spill] sm:$0xff] %v2586_v31 }
 0x1bd   :  { %716 = vmatpush.msra.mxu1 %v1928_v11  ;;  %635 = vmatpush.msrb.mxu3 %v606_v40  ;;  %v107_v11 = vpack.c.bf16 %v2552_v61, %v2552_v61 }
 0x1bf   :  { %717 = vmatpush.msra.mxu1 %v1927_v13  ;;  %636 = vmatpush.msrb.mxu3 %v605_v42  ;;  %v2614_v42 = vld [vmem:[%s3501_s23 + $0x48] sm:$0xff] }
 0x1c0   :  { %1867 = vmatmul.msk.bf16.gmra.mxu2 %vm179_vm1, %v243_v2  ;;  %1877 = vmatmul.msk.bf16.gmra.mxu3 %vm179_vm1, %v243_v2 }
 0x1c1   :  { %718 = vmatpush.msra.mxu1 %v1926_v15  ;;  %v109_v15 = vpack.c.bf16 %v2562_v1, %v2562_v1 }
 0x1c3   :  { %719 = vmatpush.msra.mxu1 %v1925_v18 }
 0x1c5   :  { %720 = vmatpush.msra.mxu1 %v1924_v20 }
 0x1c7   :  { %721 = vmatpush.msra.mxu1 %v1923_v22 }
 0x1c8   :  { %1894 = vmatmul.msk.bf16.vlgmr.msrb.gmra.mxu1 %vm179_vm1, %v2092_v3 }
 0x1c9   :  { %722 = vmatpush.msra.mxu1 %v1922_v24  ;;  %v2575_v24 = vld [vmem:[%s3501_s23 + $0x50] sm:$0xff] }
 0x1cb   :  { %723 = vmatpush.msra.mxu1 %v1921_v26 }
 0x1cd   :  { %724 = vmatpush.msra.mxu1 %v1920_v28  ;;  %v2584_v28 = vunpack.c.l.bf16 %v107_v11 }
 0x1cf   :  { %725 = vmatpush.msra.mxu1 %v1919_v30 }
 0x1d1   :  { %726 = vmatpush.msra.mxu1 %v1918_v32  ;;  %v2588_v32 = vunpack.c.l.bf16 %v109_v15 }
 0x1d3   :  { %727 = vmatpush.msra.mxu1 %v1917_v36  ;;  %v105_v36 = vpack.c.bf16 %v2580_v25, %v2580_v25 }
 0x1d5   :  { %728 = vmatpush.msra.mxu1 %v1916_v39 }
 0x1d7   :  { %729 = vmatpush.msra.mxu1 %v1915_v41  ;;  %v2609_v41 = vld [vmem:[%s3501_s23 + $0x40] sm:$0xff] }
 0x1d8   :  { %1895 = vmatmul.msk.bf16.gmra.mxu1 %vm179_vm1, %v2093_v4 }
 0x233   :  { %v308_v34 = vpop.f32.mrf.mxu2  ;;  %v343_v35 = vpop.f32.mrf.mxu3 }
 0x234   :  { %v408_v58 = vpack.c.bf16 %v343_v35, %v343_v35  ;;  %v404_v62 = vpack.c.bf16 %v308_v34, %v308_v34  ;;  %v104_v35 = vpack.c.bf16 %v2575_v24, %v2575_v24 }
 0x235   :  { %v272_v38 = vpop.f32.mrf.mxu1 }
 0x236   :  { %v2530_v48 = vadd.f32 %v2138_v43, %v272_v38  ;;  %v2532_v49 = vadd.f32 %v2139_v44, %v272_v38  ;;  %v476_v4 = vunpack.c.l.b16 %v408_v58  ;;  %v420_v16 = vunpack.c.l.b16 %v404_v62 }
 0x237   :  { %v2630_v58 = vunpack.c.l.bf16 %v105_v36  ;;  %v103_v62 = vpack.c.bf16 %v2614_v42, %v2614_v42 }
 0x23b   :  { %v310_v45 = vpop.f32.mrf.mxu2  ;;  %v345_v46 = vpop.f32.mrf.mxu3 }
 0x23c   :  { %v409_v56 = vpack.c.bf16 %v345_v46, %v345_v46  ;;  %v405_v59 = vpack.c.bf16 %v310_v45, %v310_v45 }
 0x23d   :  { %v274_v47 = vpop.f32.mrf.mxu1 }
 0x23e   :  { %v2534_v50 = vadd.f32 %v2138_v43, %v274_v47  ;;  %v2536_v51 = vadd.f32 %v2139_v44, %v274_v47  ;;  %v477_v63 = vunpack.c.l.b16 %v409_v56  ;;  %v421_v5 = vunpack.c.l.b16 %v405_v59 }
 0x23f   :  { %v2628_v56 = vunpack.c.l.bf16 %v104_v35  ;;  %v102_v59 = vpack.c.bf16 %v2609_v41, %v2609_v41  ;;  %v2684_v35 = vld [vmem:[%s3501_s23 + $0x10] sm:$0xff] }
 0x240   :  { %v480_v18 = vpack.c.b16 %v477_v63, %v476_v4  ;;  %v424_v26 = vpack.c.b16 %v421_v5, %v420_v16  ;;  %v2643_v5 = vld [vmem:[%s3501_s23 + $0x30] sm:$0xff]  ;;  %v2664_v16 = vld [vmem:[%s3501_s23 + $0x20] sm:$0xff] }
 0x241   :  { %v100_v14 = vpack.c.bf16 %v2643_v5, %v2643_v5 }
 0x242   :  { %v2590_v33 = vunpack.c.l.bf16 %v480_v18  ;;  %v2592_v34 = vunpack.c.h.bf16 %v480_v18  ;;  %v2616_v43 = vunpack.c.l.bf16 %v424_v26  ;;  %v2618_v44 = vunpack.c.h.bf16 %v424_v26 }
 0x243   :  { %v313_v54 = vpop.f32.mrf.mxu2  ;;  %v348_v55 = vpop.f32.mrf.mxu3 }
 0x244   :  { %v406_v2 = vpack.c.bf16 %v313_v54, %v313_v54  ;;  %v410_v3 = vpack.c.bf16 %v348_v55, %v348_v55  ;;  %v501_v4 = vmul.f32 %v2592_v34, %v2584_v28  ;;  %v461_v10 = vmul.f32 %v2584_v28, %v2618_v44 }
 0x245   :  { %v2542_v57 = vpop.f32.mrf.mxu1 }
 0x246   :  { %v422_v20 = vunpack.c.l.b16 %v406_v2  ;;  %v478_v21 = vunpack.c.l.b16 %v410_v3  ;;  %v500_v3 = vmul.f32 %v2590_v33, %v2582_v27 }
 0x248   :  { %v510_v18 = vpack.c.bf16 %v501_v4, %v500_v3  ;;  %v96_v4 = vpack.c.bf16 %v2684_v35, %v2684_v35 }
 0x24b   :  { %v315_v7 = vpop.f32.mrf.mxu2  ;;  %v350_v8 = vpop.f32.mrf.mxu3 }
 0x24c   :  { %v407_v12 = vpack.c.bf16 %v315_v7, %v315_v7  ;;  %v411_v13 = vpack.c.bf16 %v350_v8, %v350_v8  ;;  %v2648_v7 = vld [vmem:[%s3501_s23 + $0x38] sm:$0xff]  ;;  %v460_v8 = vmul.f32 %v2582_v27, %v2616_v43 }
 0x24d   :  { %v396_v19 = vpop.f32.mrf.mxu1  ;;  %v101_v15 = vpack.c.bf16 %v2648_v7, %v2648_v7 }
 0x24e   :  { %v423_v22 = vunpack.c.l.b16 %v407_v12  ;;  %v479_v23 = vunpack.c.l.b16 %v411_v13  ;;  %v413_v12 = vpack.c.bf16 %v396_v19, %v396_v19  ;;  %v2655_v13 = vunpack.c.l.bf16 %v102_v59 }
 0x24f   :  { %v470_v26 = vpack.c.bf16 %v461_v10, %v460_v8 }
 0x250   :  { %v425_v29 = vpack.c.b16 %v423_v22, %v422_v20  ;;  %v481_v30 = vpack.c.b16 %v479_v23, %v478_v21  ;;  %v2670_v21 = vunpack.c.l.bf16 %v103_v62  ;;  %v2675_v22 = vld [vmem:[%s3501_s23 + $0x28] sm:$0xff]  ;;  %v412_v23 = vpack.c.bf16 %v2542_v57, %v2542_v57 }
 0x251   :  { %v517_v36 = vunpack.c.l.b16 %v413_v12  ;;  %v99_v57 = vpack.c.bf16 %v2675_v22, %v2675_v22  ;;  %v496_v59 = vmul.f32 %v2590_v33, %v2655_v13  ;;  %v766_v3 = vsel %vm179_vm1, %v470_v26, 0 }
 0x252   :  { %v2598_v37 = vunpack.c.l.bf16 %v425_v29  ;;  %v2600_v38 = vunpack.c.h.bf16 %v425_v29  ;;  %v2602_v39 = vunpack.c.l.bf16 %v481_v30  ;;  %v2604_v40 = vunpack.c.h.bf16 %v481_v30 }
 0x253   :  { %v98_v30 = vpack.c.bf16 %v2664_v16, %v2664_v16  ;;  %v497_v62 = vmul.f32 %v2592_v34, %v2670_v21 }
 0x254   :  { %v502_v45 = vmul.f32 %v2602_v39, %v2586_v31  ;;  %v503_v46 = vmul.f32 %v2604_v40, %v2588_v32  ;;  %v462_v47 = vmul.f32 %v2586_v31, %v2598_v37  ;;  %v463_v54 = vmul.f32 %v2588_v32, %v2600_v38 }
 0x255   :  { %v399_v55 = vpop.f32.mrf.mxu1  ;;  %v498_v20 = vmul.f32 %v2602_v39, %v2628_v56  ;;  %v499_v19 = vmul.f32 %v2604_v40, %v2630_v58  ;;  %v459_v12 = vmul.f32 %v2630_v58, %v2600_v38 }
 0x256   :  { %v511_v63 = vpack.c.bf16 %v503_v46, %v502_v45  ;;  %v471_v2 = vpack.c.bf16 %v463_v54, %v462_v47  ;;  %v414_v29 = vpack.c.bf16 %v399_v55, %v399_v55  ;;  %v2686_v46 = vunpack.c.l.bf16 %v100_v14  ;;  %v2711_v14 = vld [vmem:[%s3501_s23] sm:$0xff] }
 0x257   :  { %v2688_v47 = vunpack.c.l.bf16 %v101_v15  ;;  %v509_v55 = vpack.c.bf16 %v499_v19, %v498_v20  ;;  %v2716_v15 = vld [vmem:[%s3501_s23 + $0x8] sm:$0xff]  ;;  %v2718_v20 = vunpack.c.l.bf16 %v98_v30  ;;  %v2720_v19 = vunpack.c.l.bf16 %v99_v57 }
 0x258   :  { %823 = vmatpush.bf16.msrb.mxu1 %v511_v63  ;;  %v769_v11 = vsel %vm179_vm1, %v471_v2, 0  ;;  %v2699_v63 = vld [vmem:[%s3501_s23 + $0x18] sm:$0xff]  ;;  %v516_v2 = vunpack.c.l.b16 %v412_v23  ;;  %v518_v8 = vunpack.c.l.b16 %v414_v29  ;;  %v508_v29 = vpack.c.bf16 %v497_v62, %v496_v59 }
 0x259   :  { %771 = vmatpush.bf16.xpose.msra.mxu3 %v769_v11  ;;  %v458_v11 = vmul.f32 %v2628_v56, %v2598_v37  ;;  %v97_v23 = vpack.c.bf16 %v2699_v63, %v2699_v63  ;;  %v95_v30 = vpack.c.bf16 %v2716_v15, %v2716_v15  ;;  %v492_v62 = vmul.f32 %v2590_v33, %v2718_v20 }
 0x25c   :  { %824 = vmatpush.bf16.msrb.mxu1 %v510_v18  ;;  %v520_v18 = vpack.c.b16 %v517_v36, %v516_v2  ;;  %v469_v2 = vpack.c.bf16 %v459_v12, %v458_v11 }
 0x25d   :  { %v401_v45 = vpop.f32.mrf.mxu1 }
 0x25e   :  { %v415_v54 = vpack.c.bf16 %v401_v45, %v401_v45  ;;  %v494_v45 = vmul.f32 %v2602_v39, %v2686_v46  ;;  %v2738_v59 = vunpack.c.l.bf16 %v520_v18  ;;  %v2746_v52 = vunpack.c.h.bf16 %v520_v18 }
 0x25f   :  { %v763_v11 = vsel %vm179_vm1, %v469_v2, 0 }
 0x260   :  { %v519_v10 = vunpack.c.l.b16 %v415_v54  ;;  %825 = vmatpush.bf16.msrb.mxu1 %v509_v55  ;;  %v495_v54 = vmul.f32 %v2604_v40, %v2688_v47  ;;  %v94_v55 = vpack.c.bf16 %v2711_v14, %v2711_v14 }
 0x261   :  { %772 = vmatpush.bf16.xpose.msra.mxu3 %v766_v3  ;;  %v2736_v3 = vunpack.c.l.bf16 %v96_v4 }
 0x262   :  { %v521_v26 = vpack.c.b16 %v519_v10, %v518_v8  ;;  %v493_v8 = vmul.f32 %v2592_v34, %v2720_v19  ;;  %v2744_v10 = vunpack.c.l.bf16 %v97_v23  ;;  %v507_v53 = vpack.c.bf16 %v495_v54, %v494_v45 }
 0x263   :  { %v457_v23 = vmul.f32 %v2670_v21, %v2618_v44  ;;  %v490_v45 = vmul.f32 %v2602_v39, %v2736_v3  ;;  %v2759_v54 = vunpack.c.l.bf16 %v94_v55 }
 0x264   :  { %v2732_v36 = vunpack.c.l.bf16 %v521_v26  ;;  %v2734_v57 = vunpack.c.h.bf16 %v521_v26  ;;  %826 = vmatpush.bf16.msrb.mxu1 %v508_v29  ;;  %v456_v29 = vmul.f32 %v2655_v13, %v2616_v43  ;;  %v506_v18 = vpack.c.bf16 %v493_v8, %v492_v62 }
 0x265   :  { %v491_v2 = vmul.f32 %v2604_v40, %v2744_v10  ;;  %v488_v55 = vmul.f32 %v2590_v33, %v2759_v54 }
 0x266   :  { %v542_v26 = vmul.f32 %v2732_v36, %v2586_v31  ;;  %v543_v4 = vmul.f32 %v2734_v57, %v2588_v32  ;;  %v2761_v31 = vunpack.c.l.bf16 %v95_v30  ;;  %v468_v62 = vpack.c.bf16 %v457_v23, %v456_v29 }
 0x267   :  { %v505_v8 = vpack.c.bf16 %v491_v2, %v490_v45  ;;  %v539_v33 = vmul.f32 %v2734_v57, %v2630_v58  ;;  %v452_v2 = vmul.f32 %v2718_v20, %v2616_v43 }
 0x268   :  { %827 = vmatpush.bf16.msrb.mxu1 %v507_v53  ;;  %v551_v12 = vpack.c.bf16 %v543_v4, %v542_v26  ;;  %v540_v26 = vmul.f32 %v2738_v59, %v2582_v27  ;;  %v541_v4 = vmul.f32 %v2746_v52, %v2584_v28  ;;  %v489_v30 = vmul.f32 %v2592_v34, %v2761_v31 }
 0x269   :  { %773 = vmatpush.bf16.xpose.msra.mxu3 %v763_v11  ;;  %v760_v40 = vsel %vm179_vm1, %v468_v62, 0  ;;  %v454_v11 = vmul.f32 %v2686_v46, %v2598_v37  ;;  %v536_v62 = vmul.f32 %v2738_v59, %v2655_v13 }
 0x26a   :  { %v589_v53 = vsel %vm179_vm1, %v551_v12, 0  ;;  %v550_v39 = vpack.c.bf16 %v541_v4, %v540_v26  ;;  %v455_v12 = vmul.f32 %v2688_v47, %v2600_v38  ;;  %v504_v23 = vpack.c.bf16 %v489_v30, %v488_v55 }
 0x26b   :  { %591 = vmatpush.bf16.xpose.msrb.mxu2 %v589_v53  ;;  %v453_v26 = vmul.f32 %v2720_v19, %v2618_v44 }
 0x26c   :  { %828 = vmatpush.bf16.msrb.mxu1 %v506_v18  ;;  %v586_v29 = vsel %vm179_vm1, %v550_v39, 0  ;;  %v538_v18 = vmul.f32 %v2732_v36, %v2628_v56  ;;  %v467_v34 = vpack.c.bf16 %v455_v12, %v454_v11  ;;  %v451_v11 = vmul.f32 %v2744_v10, %v2600_v38 }
 0x26d   :  { %v466_v39 = vpack.c.bf16 %v453_v26, %v452_v2  ;;  %v449_v38 = vmul.f32 %v2761_v31, %v2618_v44  ;;  %v533_v2 = vmul.f32 %v2746_v52, %v2720_v19  ;;  %v530_v44 = vmul.f32 %v2732_v36, %v2736_v3 }
 0x26e   :  { %v549_v45 = vpack.c.bf16 %v539_v33, %v538_v18  ;;  %v757_v53 = vsel %vm179_vm1, %v467_v34, 0 }
 0x26f   :  { %v754_v30 = vsel %vm179_vm1, %v466_v39, 0 }
 0x270   :  { %829 = vmatpush.bf16.msrb.mxu1 %v505_v8  ;;  %v583_v4 = vsel %vm179_vm1, %v549_v45, 0  ;;  %v537_v8 = vmul.f32 %v2746_v52, %v2670_v21 }
 0x271   :  { %774 = vmatpush.bf16.xpose.msra.mxu3 %v760_v40  ;;  %v450_v40 = vmul.f32 %v2736_v3, %v2598_v37  ;;  %v448_v37 = vmul.f32 %v2759_v54, %v2616_v43 }
 0x272   :  { %v548_v55 = vpack.c.bf16 %v537_v8, %v536_v62  ;;  %v531_v8 = vmul.f32 %v2734_v57, %v2744_v10 }
 0x273   :  { %592 = vmatpush.bf16.xpose.msrb.mxu2 %v586_v29  ;;  %v534_v29 = vmul.f32 %v2732_v36, %v2686_v46  ;;  %v465_v18 = vpack.c.bf16 %v451_v11, %v450_v40  ;;  %v464_v26 = vpack.c.bf16 %v449_v38, %v448_v37  ;;  %v529_v40 = vmul.f32 %v2746_v52, %v2761_v31  ;;  %v2844_v52 = vld [vmem:[%s3500_s21 + $0xe8] sm:$0xff]  ;;  %v2886_v37 = vld [vmem:[%s3500_s21 + $0xb0] sm:$0xff] }
 0x274   :  { %830 = vmatpush.bf16.msrb.mxu1 %v504_v23  ;;  %v580_v12 = vsel %vm179_vm1, %v548_v55, 0  ;;  %v535_v23 = vmul.f32 %v2734_v57, %v2688_v47  ;;  %v545_v39 = vpack.c.bf16 %v531_v8, %v530_v44  ;;  %v3554_v36 = vpack.c.bf16 %v2536_v51, %v2532_v49  ;;  %v2833_v57 = vld [vmem:[%s3500_s21 + $0xf8] sm:$0xff]  ;;  %v2850_v49 = vld [vmem:[%s3500_s21 + $0xe0] sm:$0xff]  ;;  %v2892_v38 = vld [vmem:[%s3500_s21 + $0xa8] sm:$0xff] }
 0x275   :  { %v751_v34 = vsel %vm179_vm1, %v465_v18, 0  ;;  %v748_v62 = vsel %vm179_vm1, %v464_v26, 0  ;;  %667 = vmatpush.msrb.mxu0 %v2833_v57  ;;  %v2856_v51 = vld [vmem:[%s3500_s21 + $0xd8] sm:$0xff]  ;;  %v2874_v18 = vld [vmem:[%s3500_s21 + $0xc0] sm:$0xff]  ;;  %v2910_v26 = vld [vmem:[%s3500_s21 + $0x90] sm:$0xff] }
 0x276   :  { %v547_v33 = vpack.c.bf16 %v535_v23, %v534_v29  ;;  %v571_v55 = vsel %vm179_vm1, %v545_v39, 0  ;;  %v2862_v29 = vld [vmem:[%s3500_s21 + $0xd0] sm:$0xff]  ;;  %v2868_v23 = vld [vmem:[%s3500_s21 + $0xc8] sm:$0xff]  ;;  %v2973_v8 = vld [vmem:[%s3502_s22 + $0x18] sm:$0xff] }
 0x277   :  { %3559 = vst [vmem:[#allocation6_spill] sm:$0xff] %v2973_v8  ;;  %vm694_vm12 = vcmp.gt.f32.partialorder %v2973_v8, 0.5 }
 0x278   :  { %v577_v45 = vsel %vm179_vm1, %v547_v33, 0  ;;  %v2880_v33 = vld [vmem:[%s3500_s21 + $0xb8] sm:$0xff] }
 0x279   :  { %775 = vmatpush.bf16.xpose.msra.mxu3 %v757_v53  ;;  %v532_v53 = vmul.f32 %v2738_v59, %v2718_v20 }
 0x27b   :  { %593 = vmatpush.bf16.xpose.msrb.mxu2 %v583_v4  ;;  %v546_v4 = vpack.c.bf16 %v533_v2, %v532_v53  ;;  %v2904_v53 = vld [vmem:[%s3500_s21 + $0x98] sm:$0xff] }
 0x27d   :  { %v574_v43 = vsel %vm179_vm1, %v546_v4, 0  ;;  %v2916_v4 = vld [vmem:[%s3500_s21 + $0x88] sm:$0xff] }
 0x281   :  { %776 = vmatpush.bf16.xpose.msra.mxu3 %v754_v30  ;;  %v528_v30 = vmul.f32 %v2738_v59, %v2759_v54  ;;  %v2838_v59 = vld [vmem:[%s3500_s21 + $0xf0] sm:$0xff] }
 0x282   :  { %668 = vmatpush.msrb.mxu0 %v2838_v59 }
 0x283   :  { %594 = vmatpush.bf16.xpose.msrb.mxu2 %v580_v12  ;;  %v544_v11 = vpack.c.bf16 %v529_v40, %v528_v30  ;;  %v2981_v30 = vld [vmem:[%s3502_s22 + $0x20] sm:$0xff] }
 0x284   :  { %669 = vmatpush.msrb.mxu0 %v2844_v52  ;;  %3560 = vst [vmem:[#allocation7_spill] sm:$0xff] %v2981_v30  ;;  %vm740_vm13 = vcmp.gt.f32.partialorder %v2981_v30, 0.5 }
 0x285   :  { %v568_v12 = vsel %vm179_vm1, %v544_v11, 0 }
 0x286   :  { %670 = vmatpush.msrb.mxu0 %v2850_v49 }
 0x288   :  { %671 = vmatpush.msrb.mxu0 %v2856_v51 }
 0x289   :  { %777 = vmatpush.bf16.xpose.msra.mxu3 %v751_v34 }
 0x28a   :  { %672 = vmatpush.msrb.mxu0 %v2862_v29 }
 0x28b   :  { %595 = vmatpush.bf16.xpose.msrb.mxu2 %v577_v45  ;;  %v2898_v45 = vld [vmem:[%s3500_s21 + $0xa0] sm:$0xff] }
 0x28c   :  { %673 = vmatpush.msrb.mxu0 %v2868_v23 }
 0x28e   :  { %674 = vmatpush.msrb.mxu0 %v2874_v18 }
 0x290   :  { %675 = vmatpush.msrb.mxu0 %v2880_v33 }
 0x291   :  { %778 = vmatpush.bf16.xpose.msra.mxu3 %v748_v62  ;;  %v3555_v62 = vpack.c.bf16 %v2534_v50, %v2530_v48  ;;  %v2946_v48 = vld [vmem:[%s3502_s22] sm:$0xff] }
 0x292   :  { %676 = vmatpush.msrb.mxu0 %v2886_v37  ;;  %3556 = vst [vmem:[#allocation3_spill] sm:$0xff] %v2946_v48  ;;  %vm646_vm9 = vcmp.gt.f32.partialorder %v2946_v48, 0.5 }
 0x293   :  { %596 = vmatpush.bf16.xpose.msrb.mxu2 %v574_v43  ;;  %v2927_v43 = vld [vmem:[%s3500_s21 + $0x80] sm:$0xff] }
 0x294   :  { %677 = vmatpush.msrb.mxu0 %v2892_v38 }
 0x296   :  { %678 = vmatpush.msrb.mxu0 %v2898_v45 }
 0x298   :  { %679 = vmatpush.msrb.mxu0 %v2904_v53 }
 0x29a   :  { %680 = vmatpush.msrb.mxu0 %v2910_v26 }
 0x29b   :  { %597 = vmatpush.bf16.xpose.msrb.mxu2 %v571_v55 }
 0x29c   :  { %681 = vmatpush.msrb.mxu0 %v2916_v4 }
 0x29e   :  { %682 = vmatpush.msrb.mxu0 %v2927_v43 }
 0x2a0   :  { %799 = vmatpush.msra.mxu0 %v2562_v1 }
 0x2a2   :  { %800 = vmatpush.msra.mxu0 %v2557_v0 }
 0x2a3   :  { %598 = vmatpush.bf16.xpose.msrb.mxu2 %v568_v12 }
 0x2a4   :  { %801 = vmatpush.msra.mxu0 %v2552_v61  ;;  %v2957_v61 = vld [vmem:[%s3502_s22 + $0x8] sm:$0xff] }
 0x2a5   :  { %3557 = vst [vmem:[#allocation4_spill] sm:$0xff] %v2957_v61  ;;  %vm647_vm10 = vcmp.gt.f32.partialorder %v2957_v61, 0.5 }
 0x2a6   :  { %802 = vmatpush.msra.mxu0 %v2547_v60 }
 0x2a8   :  { %803 = vmatpush.msra.mxu0 %v2580_v25 }
 0x2aa   :  { %1896 = vmatmul.msk.bf16.vlgmr.msrb.gmra.mxu2 %vm179_vm1, %v3554_v36  ;;  %804 = vmatpush.msra.mxu0 %v2575_v24  ;;  %v2965_v24 = vld [vmem:[%s3502_s22 + $0x10] sm:$0xff] }
 0x2ab   :  { %3558 = vst [vmem:[#allocation5_spill] sm:$0xff] %v2965_v24  ;;  %vm693_vm11 = vcmp.gt.f32.partialorder %v2965_v24, 0.5 }
 0x2ac   :  { %805 = vmatpush.msra.mxu0 %v2614_v42 }
 0x2ae   :  { %806 = vmatpush.msra.mxu0 %v2609_v41 }
 0x2b0   :  { %807 = vmatpush.msra.mxu0 %v2648_v7 }
 0x2b2   :  { %808 = vmatpush.msra.mxu0 %v2643_v5 }
 0x2b4   :  { %809 = vmatpush.msra.mxu0 %v2675_v22 }
 0x2b6   :  { %810 = vmatpush.msra.mxu0 %v2664_v16 }
 0x2b8   :  { %811 = vmatpush.msra.mxu0 %v2699_v63 }
 0x2ba   :  { %812 = vmatpush.msra.mxu0 %v2684_v35 }
 0x2bc   :  { %813 = vmatpush.msra.mxu0 %v2716_v15 }
 0x2be   :  { %814 = vmatpush.msra.mxu0 %v2711_v14 }
 0x32d   :  { %v600_v34 = vpop.f32.mrf.mxu2 }
 0x32e   :  { %637 = vmatmul.f32.vlgmr.msrb.gmra.mxu3 %v600_v34 }
 0x335   :  { %v602_v2 = vpop.f32.mrf.mxu2 }
 0x336   :  { %640 = vmatmul.f32.gmra.mxu3 %v602_v2 }
 0x33e   :  { %1933 = vmatmul.msk.bf16.vlgmr.msra.gmra.mxu3 %vm179_vm1, %v3555_v62 }
 0x3b1   :  { %v638_v50 = vpop.f32.mrf.mxu3 }
 0x3b2   :  { %v648_v60 = vsel %vm646_vm9, %v638_v50, %v600_v34  ;;  %v2989_v34 = vld [vmem:[%s3503_s20] sm:$0xff] }
 0x3b3   :  { %683 = vmatmul.f32.vlgmr.msrb.gmra.mxu0 %v648_v60  ;;  %3561 = vst [vmem:[#allocation8_spill] sm:$0xff] %v2989_v34 }
 0x3b9   :  { %v641_v0 = vpop.f32.mrf.mxu3 }
 0x3ba   :  { %v649_v1 = vsel %vm647_vm10, %v641_v0, %v602_v2  ;;  %v2994_v2 = vld [vmem:[%s3502_s22 + $0x28] sm:$0xff] }
 0x3bb   :  { %686 = vmatmul.f32.gmra.mxu0 %v649_v1  ;;  %3562 = vst [vmem:[#allocation9_spill] sm:$0xff] %v2994_v2  ;;  %vm741_vm14 = vcmp.gt.f32.partialorder %v2994_v2, 0.5 }
 0x3c1   :  { %v780_v40 = vpop.f32.mrf.mxu3 }
 0x3c9   :  { %v782_v0 = vpop.f32.mrf.mxu3 }
 0x430   :  { %v684_v25 = vpop.f32.mrf.mxu0 }
 0x431   :  { %v695_v44 = vsel %vm693_vm11, %v684_v25, %v648_v60 }
 0x432   :  { %730 = vmatmul.f32.vlgmr.msra.gmra.mxu1 %v695_v44 }
 0x438   :  { %v687_v39 = vpop.f32.mrf.mxu0 }
 0x439   :  { %v696_v55 = vsel %vm694_vm12, %v687_v39, %v649_v1 }
 0x43a   :  { %733 = vmatmul.f32.gmra.mxu1 %v696_v55 }
 0x4af   :  { %v731_v11 = vpop.f32.mrf.mxu1 }
 0x4b0   :  { %v742_v12 = vsel %vm740_vm13, %v731_v11, %v695_v44  ;;  %v3003_v44 = vld [vmem:[%s3503_s20 + $0x8] sm:$0xff] }
 0x4b1   :  { %v781_v36 = vadd.f32 %v780_v40, %v742_v12  ;;  %3563 = vst [vmem:[#allocation10_spill] sm:$0xff] %v3003_v44 }
 0x4b3   :  { %v785_v62 = vmul.f32 0.35355338, %v781_v36 }
 0x4b5   :  { %v787_v50 = vadd.f32 %v785_v62, %v2989_v34 }
 0x4b7   :  { %789 = vmax.xlane.f32.xlu2 %v787_v50  ;;  %v734_v60 = vpop.f32.mrf.mxu1 }
 0x4b8   :  { %v743_v1 = vsel %vm741_vm14, %v734_v60, %v696_v55 }
 0x4b9   :  { %v783_v25 = vadd.f32 %v782_v0, %v743_v1  ;;  %v2108_v0 = vld [vmem:[%s3504_s9 + $0x8] sm:$0xff] }
 0x4ba   :  { %867 = vmatpush.bf16.msra.mxu2 %v2108_v0 }
 0x4bb   :  { %v786_v39 = vmul.f32 0.35355338, %v783_v25 }
 0x4bd   :  { %v788_v40 = vadd.f32 %v786_v39, %v3003_v44 }
 0x4bf   :  { %791 = vmax.xlane.f32.xlu2 %v788_v40 }
 0x52a   :  { %v790_v11 = vpop.xlane.xlu2 %789 }
 0x52b   :  { %v793_v12 = vsub.f32 %v787_v50, %v790_v11  ;;  %v2107_v50 = vld [vmem:[%s3504_s9] sm:$0xff] }
 0x52c   :  { %868 = vmatpush.bf16.msra.mxu2 %v2107_v50 }
 0x52d   :  { %v795_v36 = vmul.f32 1.442695, %v793_v12 }
 0x52f   :  { %2155 = vpow2.f32 %v795_v36 }
 0x532   :  { %v792_v62 = vpop.xlane.xlu2 %791 }
 0x533   :  { %v794_v34 = vsub.f32 %v788_v40, %v792_v62 }
 0x535   :  { %v2156_v30 = vpop.eup %2155  ;;  %v797_v8 = vmul.f32 1.442695, %v794_v34 }
 0x536   :  { %815 = vmatmul.f32.vlgmr.msra.gmra.mxu0 %v2156_v30 }
 0x537   :  { %2157 = vpow2.f32 %v797_v8 }
 0x53d   :  { %v2158_v55 = vpop.eup %2157 }
 0x53e   :  { %818 = vmatmul.f32.gmra.mxu0 %v2158_v55  ;;  %v822_v60 = vpack.c.bf16 %v2158_v55, %v2156_v30 }
 0x540   :  { %831 = vmatmul.bf16.vlgmr.msrb.gmra.mxu1 %v822_v60 }
 0x5b3   :  { %v816_v1 = vpop.f32.mrf.mxu0 }
 0x5b4   :  { %2159 = vrcp.f32 %v816_v1 }
 0x5ba   :  { %v2160_v8 = vpop.eup %2159 }
 0x5bb   :  { %v819_v25 = vpop.f32.mrf.mxu0 }
 0x5bc   :  { %2161 = vrcp.f32 %v819_v25 }
 0x5bd   :  { %v832_v39 = vpop.f32.mrf.mxu1 }
 0x5be   :  { %v839_v30 = vmul.f32 %v2160_v8, %v832_v39 }
 0x5c2   :  { %v2162_v34 = vpop.eup %2161 }
 0x5c5   :  { %v834_v40 = vpop.f32.mrf.mxu1 }
 0x5c6   :  { %v840_v11 = vmul.f32 %v2162_v34, %v834_v40 }
 0x5c8   :  { %v841_v12 = vpack.c.bf16 %v840_v11, %v839_v30 }
 0x5ca   :  { %1942 = vmatmul.msk.bf16.vlgmr.msra.gmra.mxu2 %vm179_vm1, %v841_v12 }
 0x64d   :  { %v870_v36 = vpop.f32.mrf.mxu2 }
 0x64e   :  { %v3014_v62 = vadd.f32 %v870_v36, %v2367_v6 }
 0x650   :  { %v879_v55 = vsel %vm179_vm1, %v3014_v62, 0.0 }
 0x651   :  { %880 = vadd.xlane.f32.xlu0 %v879_v55 }
 0x655   :  { %v872_v60 = vpop.f32.mrf.mxu2 }
 0x656   :  { %v3019_v0 = vadd.f32 %v872_v60, %v2371_v9  ;;  %v2110_v60 = vld [vmem:[%s3508_s12 + $0x8] sm:$0xff] }
 0x657   :  { %963 = vmatpush.bf16.msrb.mxu0 %v2110_v60 }
 0x658   :  { %v882_v50 = vsel %vm179_vm1, %v3019_v0, 0.0 }
 0x659   :  { %883 = vadd.xlane.f32.xlu1 %v882_v50  ;;  %v2109_v50 = vld [vmem:[%s3508_s12] sm:$0xff] }
 0x65b   :  { %964 = vmatpush.bf16.msrb.mxu0 %v2109_v50  ;;  %v2140_v50 = vld [vmem:[%s3505_s16] ss:$0 sm:$0xff] }
 0x6c4   :  { %v881_v1 = vpop.xlane.xlu0 %880 }
 0x6c5   :  { %v885_v25 = vmul.f32 %v881_v1, %v2375_v17  ;;  %v2114_v1 = vld [vmem:[%s3509_s14 + $0x18] sm:$0xff] }
 0x6c6   :  { %1017 = vmatpush.bf16.msra.mxu1 %v2114_v1 }
 0x6c7   :  { %v887_v39 = vsub.f32 %v3014_v62, %v885_v25 }
 0x6c9   :  { %v889_v8 = vmul.f32 %v887_v39, %v887_v39 }
 0x6cb   :  { %v891_v6 = vsel %vm179_vm1, %v889_v8, 0.0 }
 0x6cc   :  { %892 = vadd.xlane.f32.xlu2 %v891_v6  ;;  %v884_v34 = vpop.xlane.xlu1 %883 }
 0x6cd   :  { %v886_v40 = vmul.f32 %v884_v34, %v2375_v17 }
 0x6cf   :  { %v888_v30 = vsub.f32 %v3019_v0, %v886_v40 }
 0x6d1   :  { %v890_v9 = vmul.f32 %v888_v30, %v888_v30 }
 0x6d3   :  { %v894_v11 = vsel %vm179_vm1, %v890_v9, 0.0 }
 0x6d4   :  { %895 = vadd.xlane.f32.xlu0 %v894_v11 }
 0x73f   :  { %v893_v12 = vpop.xlane.xlu2 %892 }
 0x740   :  { %v897_v36 = vmul.f32 %v893_v12, %v2375_v17 }
 0x742   :  { %v899_v55 = vadd.f32 0.001, %v897_v36 }
 0x744   :  { %2163 = vrsqrt.f32 %v899_v55  ;;  %vm907_vm2 = vweird.f32 %v899_v55 }
 0x747   :  { %v896_v25 = vpop.xlane.xlu0 %895 }
 0x748   :  { %v898_v8 = vmul.f32 %v896_v25, %v2375_v17 }
 0x74a   :  { %v2164_v6 = vpop.eup %2163  ;;  %v900_v34 = vadd.f32 0.001, %v898_v8 }
 0x74b   :  { %v902_v40 = vmul.f32 %v2164_v6, %v899_v55  ;;  %vm908_vm15 = vweird.f32 %v2164_v6 }
 0x74c   :  { %2165 = vrsqrt.f32 %v900_v34  ;;  %vm909_vm3 = vmor %vm907_vm2, %vm908_vm15  ;;  %vm917_vm5 = vweird.f32 %v900_v34 }
 0x74d   :  { %v903_v9 = vmul.f32 %v2164_v6, %v902_v40  ;;  %v2141_v40 = vld [vmem:[%s3506_s17] ss:$0 sm:$0xff] }
 0x74f   :  { %v904_v11 = vmul.f32 0.5, %v903_v9 }
 0x751   :  { %v905_v12 = vsub.f32 1.5, %v904_v11 }
 0x752   :  { %v2166_v36 = vpop.eup %2165 }
 0x753   :  { %v906_v60 = vmul.f32 %v2164_v6, %v905_v12  ;;  %v912_v44 = vmul.f32 %v2166_v36, %v900_v34  ;;  %vm918_vm4 = vweird.f32 %v2166_v36  ;;  %v2142_v34 = vld [vmem:[%s3507_s13] ss:$0 sm:$0xff] }
 0x754   :  { %vm919_vm6 = vmor %vm917_vm5, %vm918_vm4 }
 0x755   :  { %v913_v2 = vmul.f32 %v2166_v36, %v912_v44  ;;  %v910_v24 = vsel %vm909_vm3, %v2164_v6, %v906_v60 }
 0x756   :  { %v921_v1 = vmul.f32 %v910_v24, %v887_v39  ;;  %v2113_v24 = vld [vmem:[%s3509_s14 + $0x10] sm:$0xff]  ;;  %v2111_v39 = vld [vmem:[%s3509_s14] sm:$0xff] }
 0x757   :  { %v914_v61 = vmul.f32 0.5, %v913_v2  ;;  %1018 = vmatpush.bf16.msra.mxu1 %v2113_v24 }
 0x758   :  { %v926_v55 = vmul.f32 %v2140_v50, %v921_v1 }
 0x759   :  { %v915_v48 = vsub.f32 1.5, %v914_v61 }
 0x75a   :  { %v931_v6 = vadd.f32 %v2141_v40, %v926_v55 }
 0x75b   :  { %v916_v25 = vmul.f32 %v2166_v36, %v915_v48  ;;  %v2112_v48 = vld [vmem:[%s3509_s14 + $0x8] sm:$0xff] }
 0x75c   :  { %1019 = vmatpush.bf16.msra.mxu1 %v2112_v48 }
 0x75d   :  { %v920_v8 = vsel %vm919_vm6, %v2166_v36, %v916_v25  ;;  %v2143_v25 = vld [vmem:[%s3510_s15] ss:$0 sm:$0xff] }
 0x75e   :  { %v922_v44 = vmul.f32 %v920_v8, %v888_v30 }
 0x760   :  { %v927_v9 = vmul.f32 %v2140_v50, %v922_v44  ;;  %1020 = vmatpush.bf16.msra.mxu1 %v2111_v39 }
 0x762   :  { %v932_v2 = vadd.f32 %v2141_v40, %v927_v9 }
 0x764   :  { %v933_v61 = vpack.c.bf16 %v932_v2, %v931_v6 }
 0x766   :  { %1951 = vmatmul.msk.bf16.vlgmr.msrb.gmra.mxu0 %vm179_vm1, %v933_v61 }
 0x7e3   :  { %v966_v30 = vpop.f32.mrf.mxu0 }
 0x7e4   :  { %v967_v11 = vadd.f32 %v2142_v34, %v966_v30 }
 0x7e6   :  { %v971_v60 = vmax.f32 %v967_v11, 0.0 }
 0x7eb   :  { %v968_v12 = vpop.f32.mrf.mxu0 }
 0x7ec   :  { %v969_v36 = vadd.f32 %v2142_v34, %v968_v12 }
 0x7ee   :  { %v972_v50 = vmax.f32 %v969_v36, 0.0 }
 0x7f0   :  { %v973_v1 = vpack.c.bf16 %v972_v50, %v971_v60  ;;  %v2118_v60 = vld [vmem:[%s3546_s0 + $0x18] sm:$0xff] }
 0x7f1   :  { %v2120_v50 = vld [vmem:[%s3547_s27 + $0x18] sm:$0xff]  ;;  %1153 = vmatpush.bf16.msra.mxu0 %v2118_v60 }
 0x7f2   :  { %1968 = vmatmul.msk.bf16.vlgmr.msra.gmra.mxu1 %vm157_vm0, %v973_v1 }
 0x7f3   :  { %1189 = vmatpush.bf16.msrb.mxu1 %v2120_v50  ;;  %v2188_v50 = vld [vmem:[%s3500_s21 + $0x50] sm:$0xff] }
 0x86f   :  { %v1022_v8 = vpop.f32.mrf.mxu1 }
 0x870   :  { %v1023_v40 = vadd.f32 %v2143_v25, %v1022_v8  ;;  %v2117_v8 = vld [vmem:[%s3546_s0 + $0x10] sm:$0xff]  ;;  %s3574_s0 = sld [smem:[#allocation21_spill]] }
 0x871   :  { %1154 = vmatpush.bf16.msra.mxu0 %v2117_v8  ;;  %v2190_v8 = vld [vmem:[%s3500_s21 + $0x40] sm:$0xff] }
 0x872   :  { %v3064_v55 = vadd.f32 %v1023_v40, %v3014_v62  ;;  %v2119_v40 = vld [vmem:[%s3547_s27 + $0x10] sm:$0xff] }
 0x873   :  { %1190 = vmatpush.bf16.msrb.mxu1 %v2119_v40 }
 0x874   :  { %v1033_v44 = vsel %vm179_vm1, %v3064_v55, 0.0 }
 0x875   :  { %1034 = vadd.xlane.f32.xlu1 %v1033_v44 }
 0x877   :  { %v1024_v9 = vpop.f32.mrf.mxu1  ;;  %1442 = vmatpush.msra.mxu1 %v2833_v57 }
 0x878   :  { %v1025_v6 = vadd.f32 %v2143_v25, %v1024_v9  ;;  %v2116_v9 = vld [vmem:[%s3548_s30 + $0x18] sm:$0xff] }
 0x879   :  { %1116 = vmatpush.bf16.msrb.mxu2 %v2116_v9  ;;  %1443 = vmatpush.msra.mxu1 %v2838_v59  ;;  %v2187_v59 = vld [vmem:[%s3500_s21 + $0x58] sm:$0xff] }
 0x87a   :  { %v3069_v2 = vadd.f32 %v1025_v6, %v3019_v0  ;;  %v2115_v6 = vld [vmem:[%s3548_s30 + $0x10] sm:$0xff] }
 0x87b   :  { %1444 = vmatpush.msra.mxu1 %v2844_v52  ;;  %v2121_v52 = vld [vmem:[%s3549_s7 + $0x10] sm:$0xff] }
 0x87c   :  { %v1036_v61 = vsel %vm179_vm1, %v3069_v2, 0.0 }
 0x87d   :  { %1037 = vadd.xlane.f32.xlu2 %v1036_v61  ;;  %v2183_v61 = vld [vmem:[%s3500_s21 + $0x78] sm:$0xff]  ;;  %1117 = vmatpush.bf16.msrb.mxu2 %v2115_v6 }
 0x87e   :  { %1417 = vmatpush.msrb.mxu0 %v2183_v61  ;;  %1445 = vmatpush.msra.mxu1 %v2850_v49  ;;  %v2189_v49 = vld [vmem:[%s3500_s21 + $0x48] sm:$0xff] }
 0x880   :  { %1446 = vmatpush.msra.mxu1 %v2856_v51 }
 0x882   :  { %1447 = vmatpush.msra.mxu1 %v2862_v29  ;;  %v2136_v29 = vld [vmem:[%s3550_s29 + $0x1] ss:$0 sm:$0xff] }
 0x884   :  { %1448 = vmatpush.msra.mxu1 %v2868_v23  ;;  %v2191_v23 = vld [vmem:[%s3500_s21 + $0x38] sm:$0xff] }
 0x886   :  { %1449 = vmatpush.msra.mxu1 %v2874_v18 }
 0x888   :  { %1450 = vmatpush.msra.mxu1 %v2880_v33 }
 0x88a   :  { %1451 = vmatpush.msra.mxu1 %v2886_v37 }
 0x88c   :  { %1452 = vmatpush.msra.mxu1 %v2892_v38 }
 0x88e   :  { %1453 = vmatpush.msra.mxu1 %v2898_v45  ;;  %v2196_v45 = vld [vmem:[%s3500_s21 + $0x10] sm:$0xff] }
 0x890   :  { %1454 = vmatpush.msra.mxu1 %v2904_v53 }
 0x892   :  { %1455 = vmatpush.msra.mxu1 %v2910_v26  ;;  %v2199_v26 = vld [vmem:[%s3501_s23 + $0x78] sm:$0xff] }
 0x894   :  { %1456 = vmatpush.msra.mxu1 %v2916_v4  ;;  %v2200_v4 = vld [vmem:[%s3501_s23 + $0x70] sm:$0xff] }
 0x896   :  { %1457 = vmatpush.msra.mxu1 %v2927_v43  ;;  %v2202_v43 = vld [vmem:[%s3501_s23 + $0x68] sm:$0xff] }
 0x8e8   :  { %v1035_v24 = vpop.xlane.xlu1 %1034 }
 0x8e9   :  { %v1039_v48 = vmul.f32 %v1035_v24, %v2375_v17  ;;  %v2122_v24 = vld [vmem:[%s3549_s7 + $0x18] sm:$0xff] }
 0x8ea   :  { %1225 = vmatpush.bf16.msra.mxu2 %v2122_v24  ;;  %v2192_v24 = vld [vmem:[%s3500_s21 + $0x30] sm:$0xff] }
 0x8eb   :  { %v3075_v39 = vsub.f32 %v3064_v55, %v1039_v48  ;;  %v2184_v48 = vld [vmem:[%s3500_s21 + $0x70] sm:$0xff] }
 0x8ec   :  { %1418 = vmatpush.msrb.mxu0 %v2184_v48 }
 0x8ed   :  { %v1043_v62 = vmul.f32 %v3075_v39, %v3075_v39 }
 0x8ee   :  { %1226 = vmatpush.bf16.msra.mxu2 %v2121_v52  ;;  %v2201_v52 = vld [vmem:[%s3500_s21 + $0x178] sm:$0xff] }
 0x8ef   :  { %v1045_v30 = vsel %vm179_vm1, %v1043_v62, 0.0 }
 0x8f0   :  { %v1038_v34 = vpop.xlane.xlu2 %1037  ;;  %1046 = vadd.xlane.f32.xlu0 %v1045_v30 }
 0x8f1   :  { %v1040_v0 = vmul.f32 %v1038_v34, %v2375_v17  ;;  %v2185_v34 = vld [vmem:[%s3500_s21 + $0x68] sm:$0xff] }
 0x8f2   :  { %1419 = vmatpush.msrb.mxu0 %v2185_v34 }
 0x8f3   :  { %v3082_v11 = vsub.f32 %v3069_v2, %v1040_v0 }
 0x8f5   :  { %v1044_v12 = vmul.f32 %v3082_v11, %v3082_v11 }
 0x8f7   :  { %v1048_v36 = vsel %vm179_vm1, %v1044_v12, 0.0  ;;  %v2186_v12 = vld [vmem:[%s3500_s21 + $0x60] sm:$0xff] }
 0x8f8   :  { %1049 = vadd.xlane.f32.xlu1 %v1048_v36  ;;  %1420 = vmatpush.msrb.mxu0 %v2186_v12  ;;  %v2195_v12 = vld [vmem:[%s3500_s21 + $0x18] sm:$0xff] }
 0x8fa   :  { %1421 = vmatpush.msrb.mxu0 %v2187_v59  ;;  %v2197_v59 = vld [vmem:[%s3500_s21 + $0x8] sm:$0xff] }
 0x8fc   :  { %1422 = vmatpush.msrb.mxu0 %v2188_v50  ;;  %v2203_v50 = vld [vmem:[%s3500_s21 + $0x170] sm:$0xff] }
 0x8fe   :  { %1423 = vmatpush.msrb.mxu0 %v2189_v49  ;;  %v2205_v49 = vld [vmem:[%s3500_s21 + $0x168] sm:$0xff] }
 0x900   :  { %1424 = vmatpush.msrb.mxu0 %v2190_v8  ;;  %v2207_v8 = vld [vmem:[%s3500_s21 + $0x160] sm:$0xff] }
 0x902   :  { %1425 = vmatpush.msrb.mxu0 %v2191_v23  ;;  %v2211_v23 = vld [vmem:[%s3500_s21 + $0x148] sm:$0xff] }
 0x904   :  { %1426 = vmatpush.msrb.mxu0 %v2192_v24 }
 0x963   :  { %v1047_v1 = vpop.xlane.xlu0 %1046 }
 0x964   :  { %v1051_v25 = vmul.f32 %v1047_v1, %v2375_v17 }
 0x966   :  { %v1053_v44 = vadd.f32 0.001, %v1051_v25 }
 0x968   :  { %2167 = vrsqrt.f32 %v1053_v44  ;;  %vm1061_vm8 = vweird.f32 %v1053_v44 }
 0x96b   :  { %v1050_v62 = vpop.xlane.xlu1 %1049 }
 0x96c   :  { %v1052_v30 = vmul.f32 %v1050_v62, %v2375_v17 }
 0x96e   :  { %v2168_v57 = vpop.eup %2167  ;;  %v1054_v0 = vadd.f32 0.001, %v1052_v30  ;;  %v2193_v30 = vld [vmem:[%s3500_s21 + $0x28] sm:$0xff] }
 0x96f   :  { %v1056_v36 = vmul.f32 %v2168_v57, %v1053_v44  ;;  %vm1062_vm7 = vweird.f32 %v2168_v57  ;;  %v2137_v44 = vld [vmem:[%s3551_s3 + $0x1] ss:$0 sm:$0xff]  ;;  %1427 = vmatpush.msrb.mxu0 %v2193_v30 }
 0x970   :  { %2169 = vrsqrt.f32 %v1054_v0  ;;  %vm1063_vm15 = vmor %vm1061_vm8, %vm1062_vm7  ;;  %vm1071_vm3 = vweird.f32 %v1054_v0 }
 0x971   :  { %v1057_v60 = vmul.f32 %v2168_v57, %v1056_v36 }
 0x973   :  { %v1058_v1 = vmul.f32 0.5, %v1057_v60 }
 0x975   :  { %v1059_v25 = vsub.f32 1.5, %v1058_v1  ;;  %v2204_v1 = vld [vmem:[%s3501_s23 + $0x60] sm:$0xff] }
 0x976   :  { %v2170_v51 = vpop.eup %2169 }
 0x977   :  { %v1060_v40 = vmul.f32 %v2168_v57, %v1059_v25  ;;  %v1066_v9 = vmul.f32 %v2170_v51, %v1054_v0  ;;  %vm1072_vm2 = vweird.f32 %v2170_v51 }
 0x978   :  { %vm1073_vm4 = vmor %vm1071_vm3, %vm1072_vm2 }
 0x979   :  { %v1064_v6 = vsel %vm1063_vm15, %v2168_v57, %v1060_v40  ;;  %v1067_v61 = vmul.f32 %v2170_v51, %v1066_v9  ;;  %v2208_v40 = vld [vmem:[%s3500_s21 + $0x158] sm:$0xff]  ;;  %v2209_v9 = vld [vmem:[%s3501_s23 + $0x50] sm:$0xff] }
 0x97a   :  { %v1075_v18 = vmul.f32 %v1064_v6, %v3075_v39  ;;  %v2194_v39 = vld [vmem:[%s3500_s21 + $0x20] sm:$0xff] }
 0x97b   :  { %v1068_v48 = vmul.f32 0.5, %v1067_v61  ;;  %1428 = vmatpush.msrb.mxu0 %v2194_v39  ;;  %v2212_v6 = vld [vmem:[%s3500_s21 + $0x140] sm:$0xff] }
 0x97c   :  { %v1080_v62 = vmul.f32 %v2136_v29, %v1075_v18  ;;  %v2213_v61 = vld [vmem:[%s3499_s2] sm:$0xff] }
 0x97d   :  { %v1069_v33 = vsub.f32 1.5, %v1068_v48  ;;  %1429 = vmatpush.msrb.mxu0 %v2195_v12  ;;  %v2223_v12 = vld [vmem:[%s3552_s25] ss:$0 sm:$0xff]  ;;  %s3573_s25 = sld [smem:[#allocation20_spill]] }
 0x97e   :  { %v1085_v34 = vadd.f32 %v2137_v44, %v1080_v62 }
 0x97f   :  { %v1070_v57 = vmul.f32 %v2170_v51, %v1069_v33  ;;  %1430 = vmatpush.msrb.mxu0 %v2196_v45 }
 0x980   :  { %v1088_v37 = vpack.c.bf16 %v1085_v34, %v2137_v44 }
 0x981   :  { %v1074_v36 = vsel %vm1073_vm4, %v2170_v51, %v1070_v57  ;;  %1431 = vmatpush.msrb.mxu0 %v2197_v59  ;;  %v2206_v51 = vld [vmem:[%s3501_s23 + $0x58] sm:$0xff] }
 0x982   :  { %v1076_v38 = vmul.f32 %v1074_v36, %v3082_v11  ;;  %1996 = vmatmul.msk.bf16.vlgmr.msra.gmra.mxu0 %vm179_vm1, %v1088_v37  ;;  %2010 = vmatmul.msk.bf16.vlgmr.msrb.gmra.mxu1 %vm179_vm1, %v1088_v37  ;;  %v2198_v11 = vld [vmem:[%s3500_s21] sm:$0xff] }
 0x983   :  { %1432 = vmatpush.msrb.mxu0 %v2198_v11  ;;  %1547 = vmatpush.msrb.mxu1 %v2199_v26 }
 0x984   :  { %v1081_v0 = vmul.f32 %v2136_v29, %v1076_v38  ;;  %v2210_v29 = vld [vmem:[%s3500_s21 + $0x150] sm:$0xff]  ;;  %v2224_v38 = vld [vmem:[%s3498_s4] ss:$0 sm:$0xff] }
 0x985   :  { %1548 = vmatpush.msrb.mxu1 %v2200_v4 }
 0x986   :  { %v1086_v53 = vadd.f32 %v2137_v44, %v1081_v0 }
 0x987   :  { %1549 = vmatpush.msrb.mxu1 %v2202_v43 }
 0x988   :  { %v1087_v60 = vpack.c.bf16 %v1086_v53, %v1085_v34  ;;  %v1089_v25 = vpack.c.bf16 %v1086_v53, %v2137_v44  ;;  %v2217_v44 = vld [vmem:[%s3500_s21 + $0x120] sm:$0xff] }
 0x989   :  { %1550 = vmatpush.msrb.mxu1 %v2204_v1 }
 0x98a   :  { %1983 = vmatmul.msk.bf16.vlgmr.msrb.gmra.mxu2 %vm179_vm1, %v1087_v60 }
 0x98b   :  { %1467 = vmatpush.msrb.mxu2 %v2201_v52  ;;  %1551 = vmatpush.msrb.mxu1 %v2206_v51 }
 0x98d   :  { %1468 = vmatpush.msrb.mxu2 %v2203_v50  ;;  %1552 = vmatpush.msrb.mxu1 %v2209_v9 }
 0x98f   :  { %1469 = vmatpush.msrb.mxu2 %v2205_v49  ;;  %1553 = vmatpush.msrb.mxu1 %v2614_v42  ;;  %v2214_v42 = vld [vmem:[%s3500_s21 + $0x138] sm:$0xff] }
 0x991   :  { %1470 = vmatpush.msrb.mxu2 %v2207_v8  ;;  %1554 = vmatpush.msrb.mxu1 %v2609_v41  ;;  %v2215_v41 = vld [vmem:[%s3500_s21 + $0x130] sm:$0xff] }
 0x992   :  { %1997 = vmatmul.msk.bf16.gmra.mxu0 %vm179_vm1, %v1089_v25  ;;  %2011 = vmatmul.msk.bf16.gmra.mxu1 %vm179_vm1, %v1089_v25 }
 0x993   :  { %1471 = vmatpush.msrb.mxu2 %v2208_v40  ;;  %1555 = vmatpush.msrb.mxu1 %v2648_v7  ;;  %v2216_v7 = vld [vmem:[%s3500_s21 + $0x128] sm:$0xff] }
 0x995   :  { %1472 = vmatpush.msrb.mxu2 %v2210_v29  ;;  %1556 = vmatpush.msrb.mxu1 %v2643_v5  ;;  %v2218_v5 = vld [vmem:[%s3500_s21 + $0x118] sm:$0xff] }
 0x997   :  { %1473 = vmatpush.msrb.mxu2 %v2211_v23  ;;  %1557 = vmatpush.msrb.mxu1 %v2675_v22  ;;  %v2219_v22 = vld [vmem:[%s3500_s21 + $0x110] sm:$0xff] }
 0x999   :  { %1474 = vmatpush.msrb.mxu2 %v2212_v6  ;;  %1558 = vmatpush.msrb.mxu1 %v2664_v16  ;;  %v2220_v16 = vld [vmem:[%s3500_s21 + $0x108] sm:$0xff] }
 0x99a   :  { %2024 = vmatmul.msk.bf16.vlgmr.msra.gmra.mxu2 %vm179_vm1, %v2213_v61 }
 0x99b   :  { %1475 = vmatpush.msrb.mxu2 %v2214_v42  ;;  %1559 = vmatpush.msrb.mxu1 %v2699_v63  ;;  %v2221_v63 = vld [vmem:[%s3500_s21 + $0x100] sm:$0xff] }
 0x99d   :  { %1476 = vmatpush.msrb.mxu2 %v2215_v41  ;;  %1560 = vmatpush.msrb.mxu1 %v2684_v35  ;;  %v2222_v35 = vld [vmem:[%s3499_s2 + $0x8] sm:$0xff] }
 0x99f   :  { %1477 = vmatpush.msrb.mxu2 %v2216_v7  ;;  %1561 = vmatpush.msrb.mxu1 %v2716_v15 }
 0x9a1   :  { %1478 = vmatpush.msrb.mxu2 %v2217_v44  ;;  %1562 = vmatpush.msrb.mxu1 %v2711_v14 }
 0x9a3   :  { %1479 = vmatpush.msrb.mxu2 %v2218_v5 }
 0x9a5   :  { %1480 = vmatpush.msrb.mxu2 %v2219_v22 }
 0x9a7   :  { %1481 = vmatpush.msrb.mxu2 %v2220_v16 }
 0x9a9   :  { %1482 = vmatpush.msrb.mxu2 %v2221_v63 }
 0x9aa   :  { %2025 = vmatmul.msk.bf16.gmra.mxu2 %vm179_vm1, %v2222_v35 }
 0x9ff   :  { %v1156_v18 = vpop.f32.mrf.mxu0  ;;  %v1192_v15 = vpop.f32.mrf.mxu1 }
 0xa00   :  { %v1242_v14 = vpack.c.bf16 %v1192_v15, %v1192_v15  ;;  %v1238_v57 = vpack.c.bf16 %v1156_v18, %v1156_v18  ;;  %v3564_v15 = vld [vmem:[#allocation2_spill] sm:$0xff] }
 0xa02   :  { %v1294_v26 = vunpack.c.l.b16 %v1242_v14  ;;  %v1254_v51 = vunpack.c.l.b16 %v1238_v57 }
 0xa07   :  { %v1158_v24 = vpop.f32.mrf.mxu0  ;;  %v1194_v48 = vpop.f32.mrf.mxu1 }
 0xa08   :  { %v1243_v34 = vpack.c.bf16 %v1194_v48, %v1194_v48  ;;  %v1239_v39 = vpack.c.bf16 %v1158_v24, %v1158_v24 }
 0xa0a   :  { %v1295_v37 = vunpack.c.l.b16 %v1243_v34  ;;  %v1255_v4 = vunpack.c.l.b16 %v1239_v39 }
 0xa0c   :  { %v1298_v8 = vpack.c.b16 %v1295_v37, %v1294_v26  ;;  %v1258_v6 = vpack.c.b16 %v1255_v4, %v1254_v51 }
 0xa0d   :  { %v1119_v62 = vpop.f32.mrf.mxu2 }
 0xa0e   :  { %v3277_v36 = vadd.f32 %v2223_v12, %v1119_v62  ;;  %v3282_v45 = vadd.f32 %v2224_v38, %v1119_v62  ;;  %v3292_v41 = vunpack.c.l.bf16 %v1298_v8  ;;  %v3294_v7 = vunpack.c.h.bf16 %v1298_v8 }
 0xa0f   :  { %v1161_v30 = vpop.f32.mrf.mxu0  ;;  %v1197_v33 = vpop.f32.mrf.mxu1  ;;  %v3300_v35 = vunpack.c.l.bf16 %v1258_v6  ;;  %v3302_v18 = vunpack.c.h.bf16 %v1258_v6 }
 0xa10   :  { %v1240_v59 = vpack.c.bf16 %v1161_v30, %v1161_v30  ;;  %v1244_v53 = vpack.c.bf16 %v1197_v33, %v1197_v33  ;;  %v1318_v14 = vmul.f32 %v3292_v41, %v2582_v27  ;;  %v1319_v39 = vmul.f32 %v3294_v7, %v2584_v28 }
 0xa11   :  { %v1278_v37 = vmul.f32 %v3300_v35, %v2582_v27  ;;  %v1310_v6 = vmul.f32 %v3292_v41, %v2718_v20 }
 0xa12   :  { %v1256_v40 = vunpack.c.l.b16 %v1240_v59  ;;  %v1296_v9 = vunpack.c.l.b16 %v1244_v53 }
 0xa15   :  { %v1121_v0 = vpop.f32.mrf.mxu2 }
 0xa16   :  { %v3284_v11 = vadd.f32 %v2223_v12, %v1121_v0  ;;  %v3286_v60 = vadd.f32 %v2224_v38, %v1121_v0  ;;  %v1279_v12 = vmul.f32 %v3302_v18, %v2584_v28  ;;  %v1328_v0 = vpack.c.bf16 %v1319_v39, %v1318_v14 }
 0xa17   :  { %v1163_v52 = vpop.f32.mrf.mxu0  ;;  %v1199_v43 = vpop.f32.mrf.mxu1 }
 0xa18   :  { %v1372_v50 = vpack.c.bf16 %v3284_v11, %v3277_v36  ;;  %v1375_v1 = vpack.c.bf16 %v3286_v60, %v3282_v45  ;;  %v1241_v49 = vpack.c.bf16 %v1163_v52, %v1163_v52  ;;  %v1245_v25 = vpack.c.bf16 %v1199_v43, %v1199_v43 }
 0xa19   :  { %v1288_v26 = vpack.c.bf16 %v1279_v12, %v1278_v37  ;;  %v1314_v52 = vmul.f32 %v3292_v41, %v2655_v13  ;;  %v1315_v43 = vmul.f32 %v3294_v7, %v2670_v21 }
 0xa1a   :  { %v1257_v29 = vunpack.c.l.b16 %v1241_v49  ;;  %v1297_v23 = vunpack.c.l.b16 %v1245_v25 }
 0xa1b   :  { %v1514_v49 = vsel %vm179_vm1, %v1288_v26, 0 }
 0xa1c   :  { %v1259_v61 = vpack.c.b16 %v1257_v29, %v1256_v40  ;;  %v1299_v42 = vpack.c.b16 %v1297_v23, %v1296_v9  ;;  %v1326_v40 = vpack.c.bf16 %v1315_v43, %v1314_v52 }
 0xa1d   :  { %v1228_v44 = vpop.f32.mrf.mxu2 }
 0xa1e   :  { %v3296_v5 = vunpack.c.l.bf16 %v1259_v61  ;;  %v3298_v22 = vunpack.c.h.bf16 %v1259_v61  ;;  %v1304_v16 = vunpack.c.l.bf16 %v1299_v42  ;;  %v1305_v63 = vunpack.c.h.bf16 %v1299_v42 }
 0xa1f   :  { %v1311_v61 = vmul.f32 %v3294_v7, %v2720_v19 }
 0xa20   :  { %v1320_v24 = vmul.f32 %v1304_v16, %v3564_v15  ;;  %v1321_v48 = vmul.f32 %v1305_v63, %v2588_v32  ;;  %v1280_v62 = vmul.f32 %v3296_v5, %v3564_v15  ;;  %v1281_v30 = vmul.f32 %v3298_v22, %v2588_v32 }
 0xa21   :  { %v1316_v59 = vmul.f32 %v1304_v16, %v2628_v56  ;;  %v1317_v53 = vmul.f32 %v1305_v63, %v2630_v58  ;;  %v1276_v25 = vmul.f32 %v3296_v5, %v2628_v56  ;;  %v1277_v51 = vmul.f32 %v3298_v22, %v2630_v58 }
 0xa22   :  { %v1329_v33 = vpack.c.bf16 %v1321_v48, %v1320_v24  ;;  %v1289_v34 = vpack.c.bf16 %v1281_v30, %v1280_v62  ;;  %v1312_v9 = vmul.f32 %v1304_v16, %v2686_v46  ;;  %v1313_v29 = vmul.f32 %v1305_v63, %v2688_v47 }
 0xa23   :  { %v1327_v4 = vpack.c.bf16 %v1317_v53, %v1316_v59  ;;  %v1287_v23 = vpack.c.bf16 %v1277_v51, %v1276_v25  ;;  %v1274_v48 = vmul.f32 %v3300_v35, %v2655_v13  ;;  %v1275_v62 = vmul.f32 %v3302_v18, %v2670_v21 }
 0xa24   :  { %1571 = vmatpush.bf16.msra.mxu2 %v1329_v33  ;;  %v1517_v57 = vsel %vm179_vm1, %v1289_v34, 0  ;;  %v1325_v24 = vpack.c.bf16 %v1313_v29, %v1312_v9  ;;  %v1246_v30 = vpack.c.bf16 %v1228_v44, %v1228_v44  ;;  %v1324_v39 = vpack.c.bf16 %v1311_v61, %v1310_v6 }
 0xa25   :  { %v1230_v38 = vpop.f32.mrf.mxu2  ;;  %1519 = vmatpush.bf16.xpose.msra.mxu0 %v1517_v57  ;;  %v1511_v34 = vsel %vm179_vm1, %v1287_v23, 0  ;;  %v1308_v12 = vmul.f32 %v1304_v16, %v2736_v3  ;;  %v1306_v44 = vmul.f32 %v3292_v41, %v2759_v54 }
 0xa26   :  { %v1247_v42 = vpack.c.bf16 %v1230_v38, %v1230_v38  ;;  %v1309_v38 = vmul.f32 %v1305_v63, %v2744_v10  ;;  %v1334_v59 = vunpack.c.l.b16 %v1246_v30  ;;  %v1272_v63 = vmul.f32 %v3296_v5, %v2686_v46 }
 0xa28   :  { %1572 = vmatpush.bf16.msra.mxu2 %v1328_v0  ;;  %v1335_v57 = vunpack.c.l.b16 %v1247_v42  ;;  %v1286_v0 = vpack.c.bf16 %v1275_v62, %v1274_v48  ;;  %v1270_v62 = vmul.f32 %v3300_v35, %v2718_v20 }
 0xa2a   :  { %v1338_v52 = vpack.c.b16 %v1335_v57, %v1334_v59  ;;  %v1508_v25 = vsel %vm179_vm1, %v1286_v0, 0  ;;  %v1266_v0 = vmul.f32 %v3300_v35, %v2759_v54 }
 0xa2c   :  { %1573 = vmatpush.bf16.msra.mxu2 %v1327_v4  ;;  %v1307_v4 = vmul.f32 %v3294_v7, %v2761_v31  ;;  %v1342_v41 = vunpack.c.l.bf16 %v1338_v52  ;;  %v1343_v9 = vunpack.c.h.bf16 %v1338_v52 }
 0xa2d   :  { %v1233_v8 = vpop.f32.mrf.mxu2  ;;  %1520 = vmatpush.bf16.xpose.msra.mxu0 %v1514_v49  ;;  %v1323_v49 = vpack.c.bf16 %v1309_v38, %v1308_v12 }
 0xa2e   :  { %v1248_v33 = vpack.c.bf16 %v1233_v8, %v1233_v8  ;;  %v1273_v8 = vmul.f32 %v3298_v22, %v2688_v47  ;;  %v1358_v42 = vmul.f32 %v1342_v41, %v2582_v27  ;;  %v1354_v38 = vmul.f32 %v1342_v41, %v2655_v13 }
 0xa2f   :  { %v1350_v35 = vmul.f32 %v1342_v41, %v2718_v20 }
 0xa30   :  { %1574 = vmatpush.bf16.msra.mxu2 %v1326_v40  ;;  %v1336_v53 = vunpack.c.l.b16 %v1248_v33  ;;  %v1322_v40 = vpack.c.bf16 %v1307_v4, %v1306_v44  ;;  %v1285_v6 = vpack.c.bf16 %v1273_v8, %v1272_v63  ;;  %v1346_v63 = vmul.f32 %v1342_v41, %v2759_v54 }
 0xa31   :  { %v1347_v8 = vmul.f32 %v1343_v9, %v2761_v31 }
 0xa32   :  { %v1505_v48 = vsel %vm179_vm1, %v1285_v6, 0 }
 0xa33   :  { %v1362_v20 = vpack.c.bf16 %v1347_v8, %v1346_v63 }
 0xa34   :  { %1575 = vmatpush.bf16.msra.mxu2 %v1325_v24  ;;  %v1359_v24 = vmul.f32 %v1343_v9, %v2584_v28 }
 0xa35   :  { %v1235_v14 = vpop.f32.mrf.mxu2  ;;  %1521 = vmatpush.bf16.xpose.msra.mxu0 %v1511_v34 }
 0xa36   :  { %v1249_v37 = vpack.c.bf16 %v1235_v14, %v1235_v14  ;;  %v1268_v14 = vmul.f32 %v3296_v5, %v2736_v3  ;;  %v1267_v5 = vmul.f32 %v3302_v18, %v2761_v31 }
 0xa38   :  { %v1337_v26 = vunpack.c.l.b16 %v1249_v37  ;;  %1576 = vmatpush.bf16.msra.mxu2 %v1324_v39  ;;  %v1269_v39 = vmul.f32 %v3298_v22, %v2744_v10  ;;  %v1282_v59 = vpack.c.bf16 %v1267_v5, %v1266_v0  ;;  %v2124_v0 = vld [vmem:[%s3504_s9 + $0x18] sm:$0xff]  ;;  %v2123_v5 = vld [vmem:[%s3504_s9 + $0x10] sm:$0xff] }
 0xa3a   :  { %v1339_v43 = vpack.c.b16 %v1337_v26, %v1336_v53  ;;  %v1283_v37 = vpack.c.bf16 %v1269_v39, %v1268_v14 }
 0xa3c   :  { %v1344_v51 = vunpack.c.l.bf16 %v1339_v43  ;;  %v1345_v16 = vunpack.c.h.bf16 %v1339_v43  ;;  %1577 = vmatpush.bf16.msra.mxu2 %v1323_v49 }
 0xa3d   :  { %1522 = vmatpush.bf16.xpose.msra.mxu0 %v1508_v25 }
 0xa3e   :  { %v1360_v7 = vmul.f32 %v1344_v51, %v3564_v15  ;;  %v1361_v29 = vmul.f32 %v1345_v16, %v2588_v32  ;;  %v1271_v15 = vmul.f32 %v3302_v18, %v2720_v19  ;;  %v1368_v32 = vpack.c.bf16 %v1359_v24, %v1358_v42  ;;  %v3570_v42 = vld [vmem:[#allocation8_spill] sm:$0xff] }
 0xa3f   :  { %v1356_v34 = vmul.f32 %v1344_v51, %v2628_v56  ;;  %v1357_v27 = vmul.f32 %v1345_v16, %v2630_v58  ;;  %v1355_v56 = vmul.f32 %v1343_v9, %v2670_v21  ;;  %v1499_v58 = vsel %vm179_vm1, %v1283_v37, 0 }
 0xa40   :  { %1578 = vmatpush.bf16.msra.mxu2 %v1322_v40  ;;  %v1369_v23 = vpack.c.bf16 %v1361_v29, %v1360_v7  ;;  %v1284_v30 = vpack.c.bf16 %v1271_v15, %v1270_v62  ;;  %v1398_v33 = vsel %vm179_vm1, %v1368_v32, 0  ;;  %v1352_v26 = vmul.f32 %v1344_v51, %v2686_v46  ;;  %v2126_v40 = vld [vmem:[%s3508_s12 + $0x18] sm:$0xff] }
 0xa41   :  { %v1367_v57 = vpack.c.bf16 %v1357_v27, %v1356_v34  ;;  %v1366_v22 = vpack.c.bf16 %v1355_v56, %v1354_v38  ;;  %v1353_v13 = vmul.f32 %v1345_v16, %v2688_v47  ;;  %v1496_v21 = vsel %vm179_vm1, %v1282_v59, 0  ;;  %v3572_v34 = vld [vmem:[#allocation10_spill] sm:$0xff] }
 0xa42   :  { %v1401_v61 = vsel %vm179_vm1, %v1369_v23, 0  ;;  %v1502_v28 = vsel %vm179_vm1, %v1284_v30, 0  ;;  %v1351_v18 = vmul.f32 %v1343_v9, %v2720_v19  ;;  %v1348_v49 = vmul.f32 %v1344_v51, %v2736_v3 }
 0xa43   :  { %1403 = vmatpush.bf16.xpose.msrb.mxu3 %v1401_v61  ;;  %v1395_v12 = vsel %vm179_vm1, %v1367_v57, 0  ;;  %v1392_v53 = vsel %vm179_vm1, %v1366_v22, 0  ;;  %v1365_v44 = vpack.c.bf16 %v1353_v13, %v1352_v26  ;;  %v1349_v46 = vmul.f32 %v1345_v16, %v2744_v10 }
 0xa44   :  { %v1364_v52 = vpack.c.bf16 %v1351_v18, %v1350_v35  ;;  %v1380_v19 = vsel %vm179_vm1, %v1362_v20, 0 }
 0xa45   :  { %1523 = vmatpush.bf16.xpose.msra.mxu0 %v1505_v48  ;;  %v1389_v4 = vsel %vm179_vm1, %v1365_v44, 0  ;;  %v1363_v47 = vpack.c.bf16 %v1349_v46, %v1348_v49 }
 0xa46   :  { %v1386_v43 = vsel %vm179_vm1, %v1364_v52, 0 }
 0xa47   :  { %v1383_v25 = vsel %vm179_vm1, %v1363_v47, 0 }
 0xa4b   :  { %1404 = vmatpush.bf16.xpose.msrb.mxu3 %v1398_v33 }
 0xa4d   :  { %1524 = vmatpush.bf16.xpose.msra.mxu0 %v1502_v28 }
 0xa53   :  { %1405 = vmatpush.bf16.xpose.msrb.mxu3 %v1395_v12 }
 0xa55   :  { %1525 = vmatpush.bf16.xpose.msra.mxu0 %v1499_v58 }
 0xa5b   :  { %1406 = vmatpush.bf16.xpose.msrb.mxu3 %v1392_v53 }
 0xa5d   :  { %1526 = vmatpush.bf16.xpose.msra.mxu0 %v1496_v21 }
 0xa63   :  { %1407 = vmatpush.bf16.xpose.msrb.mxu3 %v1389_v4 }
 0xa6b   :  { %1408 = vmatpush.bf16.xpose.msrb.mxu3 %v1386_v43 }
 0xa73   :  { %1409 = vmatpush.bf16.xpose.msrb.mxu3 %v1383_v25 }
 0xa7b   :  { %1410 = vmatpush.bf16.xpose.msrb.mxu3 %v1380_v19 }
 0xa82   :  { %2026 = vmatmul.msk.bf16.vlgmr.msrb.gmra.mxu3 %vm179_vm1, %v1375_v1 }
 0xa83   :  { %1616 = vmatpush.bf16.msra.mxu3 %v2124_v0  ;;  %v2146_v0 = vld [vmem:[%s3507_s13 + $0x1] ss:$0 sm:$0xff] }
 0xa87   :  { %1617 = vmatpush.bf16.msra.mxu3 %v2123_v5 }
 0xb05   :  { %v1412_v3 = vpop.f32.mrf.mxu3 }
 0xb06   :  { %1433 = vmatmul.f32.vlgmr.msrb.gmra.mxu0 %v1412_v3 }
 0xb0d   :  { %v1414_v10 = vpop.f32.mrf.mxu3 }
 0xb0e   :  { %1436 = vmatmul.f32.gmra.mxu0 %v1414_v10 }
 0xb16   :  { %2027 = vmatmul.msk.bf16.vlgmr.msra.gmra.mxu0 %vm179_vm1, %v1372_v50 }
 0xb83   :  { %v1434_v31 = vpop.f32.mrf.mxu0 }
 0xb84   :  { %v1440_v51 = vsel %vm646_vm9, %v1434_v31, %v1412_v3 }
 0xb85   :  { %1458 = vmatmul.f32.vlgmr.msra.gmra.mxu1 %v1440_v51 }
 0xb86   :  { %1716 = vmatpush.bf16.msra.mxu1 %v2126_v40 }
 0xb8b   :  { %v1437_v16 = vpop.f32.mrf.mxu0 }
 0xb8c   :  { %v1441_v45 = vsel %vm647_vm10, %v1437_v16, %v1414_v10 }
 0xb8d   :  { %1461 = vmatmul.f32.gmra.mxu1 %v1441_v45 }
 0xb93   :  { %v1528_v11 = vpop.f32.mrf.mxu0 }
 0xb9b   :  { %v1530_v62 = vpop.f32.mrf.mxu0 }
 0xc02   :  { %v1459_v60 = vpop.f32.mrf.mxu1 }
 0xc03   :  { %v1465_v41 = vsel %vm693_vm11, %v1459_v60, %v1440_v51  ;;  %v2130_v60 = vld [vmem:[%s3509_s14 + $0x38] sm:$0xff] }
 0xc04   :  { %1483 = vmatmul.f32.vlgmr.msrb.gmra.mxu2 %v1465_v41 }
 0xc05   :  { %1772 = vmatpush.bf16.msrb.mxu2 %v2130_v60 }
 0xc0a   :  { %v1462_v9 = vpop.f32.mrf.mxu1 }
 0xc0b   :  { %v1466_v36 = vsel %vm694_vm12, %v1462_v9, %v1441_v45  ;;  %v2125_v45 = vld [vmem:[%s3508_s12 + $0x10] sm:$0xff] }
 0xc0c   :  { %1486 = vmatmul.f32.gmra.mxu2 %v1466_v36  ;;  %1717 = vmatpush.bf16.msra.mxu1 %v2125_v45 }
 0xc87   :  { %v1484_v50 = vpop.f32.mrf.mxu2 }
 0xc88   :  { %v1490_v23 = vsel %vm740_vm13, %v1484_v50, %v1465_v41 }
 0xc89   :  { %v1529_v6 = vadd.f32 %v1528_v11, %v1490_v23 }
 0xc8b   :  { %v1533_v61 = vmul.f32 0.35355338, %v1529_v6 }
 0xc8d   :  { %v1535_v24 = vadd.f32 %v1533_v61, %v3570_v42 }
 0xc8f   :  { %1537 = vmax.xlane.f32.xlu2 %v1535_v24  ;;  %v1487_v48 = vpop.f32.mrf.mxu2 }
 0xc90   :  { %v1491_v32 = vsel %vm741_vm14, %v1487_v48, %v1466_v36 }
 0xc91   :  { %v1531_v30 = vadd.f32 %v1530_v62, %v1491_v32 }
 0xc93   :  { %v1534_v33 = vmul.f32 0.35355338, %v1531_v30 }
 0xc95   :  { %v1536_v27 = vadd.f32 %v1534_v33, %v3572_v34  ;;  %v2145_v33 = vld [vmem:[%s3506_s17 + $0x1] ss:$0 sm:$0xff] }
 0xc97   :  { %1539 = vmax.xlane.f32.xlu0 %v1536_v27 }
 0xd02   :  { %v1538_v28 = vpop.xlane.xlu2 %1537 }
 0xd03   :  { %v1541_v14 = vsub.f32 %v1535_v24, %v1538_v28 }
 0xd05   :  { %v1543_v39 = vmul.f32 1.442695, %v1541_v14 }
 0xd07   :  { %2171 = vpow2.f32 %v1543_v39 }
 0xd0a   :  { %v1540_v57 = vpop.xlane.xlu0 %1539 }
 0xd0b   :  { %v1542_v37 = vsub.f32 %v1536_v27, %v1540_v57 }
 0xd0d   :  { %v2172_v12 = vpop.eup %2171  ;;  %v1545_v38 = vmul.f32 1.442695, %v1542_v37  ;;  %v2129_v37 = vld [vmem:[%s3509_s14 + $0x30] sm:$0xff] }
 0xd0e   :  { %1563 = vmatmul.f32.vlgmr.msrb.gmra.mxu1 %v2172_v12  ;;  %1773 = vmatpush.bf16.msrb.mxu2 %v2129_v37 }
 0xd0f   :  { %2173 = vpow2.f32 %v1545_v38  ;;  %v2127_v38 = vld [vmem:[%s3509_s14 + $0x20] sm:$0xff] }
 0xd15   :  { %v2174_v56 = vpop.eup %2173 }
 0xd16   :  { %1566 = vmatmul.f32.gmra.mxu1 %v2174_v56  ;;  %v1570_v58 = vpack.c.bf16 %v2174_v56, %v2172_v12  ;;  %v2128_v12 = vld [vmem:[%s3509_s14 + $0x28] sm:$0xff] }
 0xd17   :  { %1774 = vmatpush.bf16.msrb.mxu2 %v2128_v12  ;;  %v2132_v56 = vld [vmem:[%s3511_s18 + $0x8] sm:$0xff] }
 0xd18   :  { %1579 = vmatmul.bf16.vlgmr.msra.gmra.mxu2 %v1570_v58  ;;  %1814 = vmatpush.bf16.msrb.mxu3 %v2132_v56 }
 0xd1b   :  { %1775 = vmatpush.bf16.msrb.mxu2 %v2127_v38 }
 0xd8b   :  { %v1564_v22 = vpop.f32.mrf.mxu1 }
 0xd8c   :  { %2175 = vrcp.f32 %v1564_v22 }
 0xd92   :  { %v2176_v26 = vpop.eup %2175 }
 0xd93   :  { %v1567_v59 = vpop.f32.mrf.mxu1 }
 0xd94   :  { %2177 = vrcp.f32 %v1567_v59 }
 0xd9a   :  { %v2178_v13 = vpop.eup %2177 }
 0xd9b   :  { %v1580_v53 = vpop.f32.mrf.mxu2 }
 0xd9c   :  { %v1587_v44 = vmul.f32 %v2176_v26, %v1580_v53 }
 0xda3   :  { %v1582_v21 = vpop.f32.mrf.mxu2 }
 0xda4   :  { %v1588_v4 = vmul.f32 %v2178_v13, %v1582_v21  ;;  %v2131_v21 = vld [vmem:[%s3511_s18] sm:$0xff] }
 0xda5   :  { %1815 = vmatpush.bf16.msrb.mxu3 %v2131_v21 }
 0xda6   :  { %v1589_v35 = vpack.c.bf16 %v1588_v4, %v1587_v44  ;;  %v2147_v4 = vld [vmem:[%s3510_s15 + $0x1] ss:$0 sm:$0xff] }
 0xda8   :  { %2040 = vmatmul.msk.bf16.vlgmr.msra.gmra.mxu3 %vm179_vm1, %v1589_v35 }
 0xe2b   :  { %v1619_v18 = vpop.f32.mrf.mxu3 }
 0xe2c   :  { %v3422_v52 = vadd.f32 %v1619_v18, %v3064_v55 }
 0xe2e   :  { %v1630_v43 = vsel %vm179_vm1, %v3422_v52, 0.0 }
 0xe2f   :  { %1631 = vadd.xlane.f32.xlu1 %v1630_v43 }
 0xe33   :  { %v1621_v49 = vpop.f32.mrf.mxu3 }
 0xe34   :  { %v3427_v46 = vadd.f32 %v1621_v49, %v3069_v2 }
 0xe36   :  { %v1633_v47 = vsel %vm179_vm1, %v3427_v46, 0.0 }
 0xe37   :  { %1634 = vadd.xlane.f32.xlu2 %v1633_v47 }
 0xea2   :  { %v1632_v25 = vpop.xlane.xlu1 %1631 }
 0xea3   :  { %v1636_v63 = vmul.f32 %v1632_v25, %v2375_v17 }
 0xea5   :  { %v1638_v8 = vsub.f32 %v3422_v52, %v1636_v63  ;;  %v2148_v63 = vld [vmem:[%s3573_s25] ss:$0 sm:$0xff] }
 0xea7   :  { %v1640_v20 = vmul.f32 %v1638_v8, %v1638_v8 }
 0xea9   :  { %v1642_v55 = vsel %vm179_vm1, %v1640_v20, 0.0 }
 0xeaa   :  { %1643 = vadd.xlane.f32.xlu0 %v1642_v55  ;;  %v1635_v19 = vpop.xlane.xlu2 %1634 }
 0xeab   :  { %v1637_v3 = vmul.f32 %v1635_v19, %v2375_v17 }
 0xead   :  { %v1639_v10 = vsub.f32 %v3427_v46, %v1637_v3 }
 0xeaf   :  { %v1641_v2 = vmul.f32 %v1639_v10, %v1639_v10 }
 0xeb1   :  { %v1645_v31 = vsel %vm179_vm1, %v1641_v2, 0.0 }
 0xeb2   :  { %1646 = vadd.xlane.f32.xlu1 %v1645_v31 }
 0xf1d   :  { %v1644_v54 = vpop.xlane.xlu0 %1643 }
 0xf1e   :  { %v1648_v51 = vmul.f32 %v1644_v54, %v2375_v17 }
 0xf20   :  { %v1650_v16 = vadd.f32 0.001, %v1648_v51 }
 0xf22   :  { %2179 = vrsqrt.f32 %v1650_v16  ;;  %vm1658_vm10 = vweird.f32 %v1650_v16 }
 0xf25   :  { %v1647_v1 = vpop.xlane.xlu1 %1646 }
 0xf26   :  { %v1649_v41 = vmul.f32 %v1647_v1, %v2375_v17  ;;  %v2144_v17 = vld [vmem:[%s3505_s16 + $0x1] ss:$0 sm:$0xff] }
 0xf28   :  { %v2180_v9 = vpop.eup %2179  ;;  %v1651_v7 = vadd.f32 0.001, %v1649_v41 }
 0xf29   :  { %v1653_v36 = vmul.f32 %v2180_v9, %v1650_v16  ;;  %vm1659_vm9 = vweird.f32 %v2180_v9 }
 0xf2a   :  { %2181 = vrsqrt.f32 %v1651_v7  ;;  %vm1660_vm11 = vmor %vm1658_vm10, %vm1659_vm9  ;;  %vm1668_vm13 = vweird.f32 %v1651_v7 }
 0xf2b   :  { %v1654_v11 = vmul.f32 %v2180_v9, %v1653_v36 }
 0xf2d   :  { %v1655_v50 = vmul.f32 0.5, %v1654_v11 }
 0xf2f   :  { %v1656_v29 = vsub.f32 1.5, %v1655_v50 }
 0xf30   :  { %v2182_v23 = vpop.eup %2181 }
 0xf31   :  { %v1657_v6 = vmul.f32 %v2180_v9, %v1656_v29  ;;  %v1663_v61 = vmul.f32 %v2182_v23, %v1651_v7  ;;  %vm1669_vm12 = vweird.f32 %v2182_v23 }
 0xf32   :  { %vm1670_vm14 = vmor %vm1668_vm13, %vm1669_vm12 }
 0xf33   :  { %v1664_v42 = vmul.f32 %v2182_v23, %v1663_v61  ;;  %v1661_v24 = vsel %vm1660_vm11, %v2180_v9, %v1657_v6 }
 0xf34   :  { %v1672_v15 = vmul.f32 %v1661_v24, %v1638_v8 }
 0xf35   :  { %v1665_v48 = vmul.f32 0.5, %v1664_v42 }
 0xf36   :  { %v1677_v34 = vmul.f32 %v2144_v17, %v1672_v15 }
 0xf37   :  { %v1666_v62 = vsub.f32 1.5, %v1665_v48 }
 0xf38   :  { %v1682_v14 = vadd.f32 %v2145_v33, %v1677_v34 }
 0xf39   :  { %v1667_v32 = vmul.f32 %v2182_v23, %v1666_v62 }
 0xf3b   :  { %v1671_v30 = vsel %vm1670_vm14, %v2182_v23, %v1667_v32 }
 0xf3c   :  { %v1673_v27 = vmul.f32 %v1671_v30, %v1639_v10 }
 0xf3e   :  { %v1678_v28 = vmul.f32 %v2144_v17, %v1673_v27 }
 0xf40   :  { %v1683_v39 = vadd.f32 %v2145_v33, %v1678_v28 }
 0xf42   :  { %v1684_v57 = vpack.c.bf16 %v1683_v39, %v1682_v14 }
 0xf44   :  { %2056 = vmatmul.msk.bf16.vlgmr.msra.gmra.mxu1 %vm179_vm1, %v1684_v57 }
 0xfc1   :  { %v1719_v58 = vpop.f32.mrf.mxu1 }
 0xfc2   :  { %v1720_v5 = vadd.f32 %v2146_v0, %v1719_v58 }
 0xfc4   :  { %v1724_v53 = vmax.f32 %v1720_v5, 0.0 }
 0xfc9   :  { %v1721_v22 = vpop.f32.mrf.mxu1 }
 0xfca   :  { %v1722_v59 = vadd.f32 %v2146_v0, %v1721_v22 }
 0xfcc   :  { %v1725_v26 = vmax.f32 %v1722_v59, 0.0 }
 0xfce   :  { %v1726_v13 = vpack.c.bf16 %v1725_v26, %v1724_v53 }
 0xfd0   :  { %2082 = vmatmul.msk.bf16.vlgmr.msrb.gmra.mxu2 %vm157_vm0, %v1726_v13 }
0x1053   :  { %v1777_v44 = vpop.f32.mrf.mxu2 }
0x1054   :  { %v1778_v35 = vadd.f32 %v2147_v4, %v1777_v44 }
0x1056   :  { %v1782_v49 = vadd.f32 %v1778_v35, %v3422_v52 }
0x105b   :  { %v1779_v18 = vpop.f32.mrf.mxu2 }
0x105c   :  { %v1780_v43 = vadd.f32 %v2147_v4, %v1779_v18 }
0x105e   :  { %v1783_v47 = vadd.f32 %v1780_v43, %v3427_v46 }
0x1060   :  { %v1784_v25 = vpack.c.bf16 %v1783_v47, %v1782_v49 }
0x1062   :  { %2091 = vmatmul.msk.bf16.vlgmr.msrb.gmra.mxu3 %vm179_vm1, %v1784_v25 }
0x10e5   :  { %v1817_v8 = vpop.f32.mrf.mxu3 }
0x10e6   :  { %v1818_v20 = vadd.f32 %v2148_v63, %v1817_v8 }
0x10e8   :  { %1822 = vst [vmem:[%s3574_s0] sm:$0xff] %v1818_v20 }
0x10ed   :  { %v1819_v55 = vpop.f32.mrf.mxu3 }
0x10ee   :  { %v1820_v19 = vadd.f32 %v2148_v63, %v1819_v55 }
0x10f0   :  { %1823 = vst [vmem:[%s3574_s0 + $0x8] sm:$0xff] %v1820_v19 }

</bundles_post_ra>
